<compile_context>
chip_gen: v7x
topology: tpu7x:2x2x1
jax: 0.10.0
libtpu: 0.0.40
codegen_flags: <defaults>
</compile_context>

<pallas_src>
import functools

import jax
import jax.numpy as jnp
from jax.experimental import pallas as pl
from jax.experimental.pallas import tpu as pltpu


def _procnncl_kernel(x_ref, w1_ref, b1_ref, w2_ref, b2_ref, o_ref):
    mm_dtype = w1_ref.dtype          # matmul operand dtype (f32 or bf16)
    # x arrives f32; cast on the VPU in VMEM — no separate wrapper cast over HBM.
    x = x_ref[...].astype(mm_dtype)

    # target_projector: Linear + ReLU (MXU matmul, f32 accumulate; epilogue in f32)
    h = jnp.dot(x, w1_ref[...], preferred_element_type=jnp.float32) + b1_ref[...]
    h = jnp.maximum(h, 0.0)

    # target_projector2: Linear + ReLU
    h = jnp.dot(h.astype(mm_dtype), w2_ref[...],
                preferred_element_type=jnp.float32) + b2_ref[...]
    h = jnp.maximum(h, 0.0)

    # target_projector2 applied a second time (matches the PyTorch forward;
    # target_projector3 is defined but unused there).
    h = jnp.dot(h.astype(mm_dtype), w2_ref[...],
                preferred_element_type=jnp.float32) + b2_ref[...]
    h = jnp.maximum(h, 0.0)

    # F.normalize(dim=-1): x / max(||x||_2, 1e-12)  ==  x * rsqrt(max(sum(x^2), 1e-24))
    sumsq = jnp.sum(h * h, axis=-1, keepdims=True)
    inv = jax.lax.rsqrt(jnp.maximum(sumsq, 1e-24))
    o_ref[...] = (h * inv).astype(o_ref.dtype)


def _vmem_capacity_bytes():
    # Generation-aware physical VMEM (per TensorCore): 128 MiB on v5e/v6e, 64 MiB on v7x.
    try:
        return int(pltpu.get_tpu_info().vmem_capacity_bytes)
    except Exception:
        return 64 * 1024 * 1024      # conservative per-core v7x ceiling


def _vmem_need_bytes(block_b, d_in, d_lat, mm_bytes, out_bytes, weight_buffers):
    return (
        2 * block_b * d_in * 4                                     # x tile, f32, double-buffered
        + 2 * block_b * d_lat * out_bytes                          # out tile, double-buffered
        + weight_buffers * (d_in + d_lat) * d_lat * mm_bytes       # W1 + W2 residency
        + weight_buffers * 2 * d_lat * 4                           # biases (f32)
        + 5 * block_b * d_lat * 4                                  # f32 intermediates / cast headroom
    )


def _pick_block_b(B, usable, d_in, d_lat, mm_bytes, out_bytes, weight_buffers):
    """Largest power-of-two tile dividing B that fits VMEM and leaves >=2 grid steps
    (prefer an even step count so v7x's two TensorCores stay balanced)."""
    if B <= 16:
        return B
    candidates = [
        c for c in (1024, 512, 256, 128, 64, 32, 16, 8)
        if B % c == 0 and B // c >= 2
        and _vmem_need_bytes(c, d_in, d_lat, mm_bytes, out_bytes, weight_buffers) <= usable
    ]
    if not candidates:
        return 8 if B % 8 == 0 else B      # budget assert downstream gives a clear error
    even = [c for c in candidates if (B // c) % 2 == 0]
    return (even or candidates)[0]


@functools.partial(jax.jit, static_argnames=("block_b", "out_dtype", "weight_buffers"))
def procnncl_forward(features, w1, b1, w2, b2, *, block_b=None,
                     out_dtype=jnp.float32, weight_buffers=1):
    """features: (B, target_shape) f32.  w1: (target_shape, latent).  w2: (latent, latent).

    Matmul operand dtype follows the weight dtype — pre-cast weights to bf16 ONCE for
    the fast path; activations are always read as f32 and cast on the VPU in-kernel.
    out_dtype=jnp.bfloat16 halves output writeback if downstream tolerates it (v5e win).
    """
    B, d_in = features.shape
    d_lat = w1.shape[1]
    assert w1.shape == (d_in, d_lat)
    assert w2.shape == (d_lat, d_lat)
    assert b1.shape == (d_lat,) and b2.shape == (d_lat,)
    assert w1.dtype == w2.dtype, "W1/W2 must share the matmul operand dtype"
    # Lane alignment keeps MXU tiles unpadded and output stores unmasked.
    # (Prefer multiples of 256 when you control the dims: v6e/v7x MXUs are 256-wide.)
    assert d_in % 128 == 0 and d_lat % 128 == 0, "d_in / d_lat must be multiples of 128"

    mm_dtype = jnp.dtype(w1.dtype)
    mm_bytes = mm_dtype.itemsize
    out_dtype = jnp.dtype(out_dtype)
    out_bytes = out_dtype.itemsize

    vmem_cap = _vmem_capacity_bytes()
    usable = int(vmem_cap * 0.85)            # leave headroom for Mosaic internal scratch

    if block_b is None:
        block_b = _pick_block_b(B, usable, d_in, d_lat, mm_bytes, out_bytes, weight_buffers)
    block_b = min(block_b, B)
    assert B % block_b == 0, "B must be a multiple of block_b"
    assert block_b == B or block_b % 8 == 0, "block_b must be sublane (8) aligned"

    vmem_need = _vmem_need_bytes(block_b, d_in, d_lat, mm_bytes, out_bytes, weight_buffers)
    assert vmem_need <= usable, (
        "weights + tiles exceed per-core VMEM; shrink block_b, use bf16 weights, "
        "or tile W2 over its N dim")
    vmem_limit = int(min(max(2 * vmem_need, 16 * 1024 * 1024), usable))

    b1_2d = b1.reshape(1, d_lat).astype(jnp.float32)
    b2_2d = b2.reshape(1, d_lat).astype(jnp.float32)

    # Grid-invariant operands (constant block index): single-buffer them.
    weight_mode = {} if weight_buffers == 2 else {"pipeline_mode": pl.Buffered(weight_buffers)}

    grid = (B // block_b,)
    return pl.pallas_call(
        _procnncl_kernel,
        out_shape=jax.ShapeDtypeStruct((B, d_lat), out_dtype),
        grid_spec=pltpu.PrefetchScalarGridSpec(
            num_scalar_prefetch=0,
            grid=grid,
            in_specs=[
                pl.BlockSpec((block_b, d_in), lambda i: (i, 0)),                 # x tile (f32)
                pl.BlockSpec((d_in, d_lat), lambda i: (0, 0), **weight_mode),    # W1 (full)
                pl.BlockSpec((1, d_lat), lambda i: (0, 0), **weight_mode),       # b1
                pl.BlockSpec((d_lat, d_lat), lambda i: (0, 0), **weight_mode),   # W2 (full)
                pl.BlockSpec((1, d_lat), lambda i: (0, 0), **weight_mode),       # b2
            ],
            out_specs=pl.BlockSpec((block_b, d_lat), lambda i: (i, 0)),
        ),
        compiler_params=pltpu.CompilerParams(
            dimension_semantics=("parallel",),
            vmem_limit_bytes=vmem_limit,
        ),
    )(features.astype(jnp.float32), w1, b1_2d, w2, b2_2d)


def _xavier_normal(key, shape_out_in):
    # matches nn.init.xavier_normal_ on a PyTorch (out, in) weight
    fan_out, fan_in = shape_out_in
    std = jnp.sqrt(2.0 / (fan_in + fan_out))
    return jax.random.normal(key, shape_out_in, dtype=jnp.float32) * std


def _reference(features, w1, b1, w2, b2):
    h = jax.nn.relu(features @ w1 + b1)
    h = jax.nn.relu(h @ w2 + b2)
    h = jax.nn.relu(h @ w2 + b2)
    n = jnp.maximum(jnp.linalg.norm(h, axis=-1, keepdims=True), 1e-12)
    return h / n


if __name__ == "__main__":
    # Small but tiling-exercising shapes: 256-wide square projectors, batch 512.
    # Auto block_b picks 256 -> grid of 2 even steps (both v7x TensorCores get work).
    B = 512
    target_shape = 256
    latent_dim = 256

    key = jax.random.PRNGKey(0)
    k_x, k_w1, k_b1, k_w2, k_b2 = jax.random.split(key, 5)

    features = jax.random.normal(k_x, (B, target_shape), dtype=jnp.float32)

    # PyTorch stores Linear weights as (out, in); xavier_normal_ then transpose
    # to (in, out) for the x @ W layout used by the kernel.
    w1 = _xavier_normal(k_w1, (latent_dim, target_shape)).T       # (in, out)
    w2 = _xavier_normal(k_w2, (latent_dim, latent_dim)).T         # (in, out)
    bound1 = 1.0 / jnp.sqrt(float(target_shape))
    bound2 = 1.0 / jnp.sqrt(float(latent_dim))
    b1 = jax.random.uniform(k_b1, (latent_dim,), minval=-bound1, maxval=bound1,
                            dtype=jnp.float32)
    b2 = jax.random.uniform(k_b2, (latent_dim,), minval=-bound2, maxval=bound2,
                            dtype=jnp.float32)

    ref = _reference(features, w1, b1, w2, b2)

    # f32-operand path (tight tolerance vs reference).
    out_f32 = jax.block_until_ready(procnncl_forward(features, w1, b1, w2, b2))
    assert out_f32.shape == (B, latent_dim)
    assert jnp.allclose(out_f32, ref, atol=1e-4, rtol=1e-4), "f32 path mismatch vs reference"

    # bf16-operand path (recommended default on every generation): weights are
    # pre-cast ONCE outside the hot path; activations stay f32 in HBM and are cast
    # in-kernel; accumulation / bias / ReLU / normalize stay f32.
    w1_bf16 = w1.astype(jnp.bfloat16)
    w2_bf16 = w2.astype(jnp.bfloat16)
    out_bf16 = jax.block_until_ready(procnncl_forward(features, w1_bf16, b1, w2_bf16, b2))
    assert out_bf16.shape == (B, latent_dim)
    assert jnp.allclose(out_bf16, ref, atol=3e-2, rtol=3e-2), "bf16 path mismatch vs reference"

    print("KERNEL_OK")
</pallas_src>

<mosaic_0001>
module attributes {stable_mosaic.version = 11 : i64} {
  func.func @_procnncl_kernel(%arg0: i32, %arg1: memref<256x256xf32, #tpu.memory_space<vmem>>, %arg2: memref<256x256xf32, #tpu.memory_space<vmem>>, %arg3: memref<1x256xf32, #tpu.memory_space<vmem>>, %arg4: memref<256x256xf32, #tpu.memory_space<vmem>>, %arg5: memref<1x256xf32, #tpu.memory_space<vmem>>, %arg6: memref<256x256xf32, #tpu.memory_space<vmem>>) attributes {dimension_semantics = [#tpu.dimension_semantics<parallel>], iteration_bounds = array<i64: 2>, scalar_prefetch = 0 : i64, scratch_operands = 0 : i64, tpu.core_type = #tpu.core_type<tc>, window_params = [{transform_indices = @transform_0, window_bounds = array<i64: 256, 256>}, {pipeline_mode = #tpu.pipeline_mode<synchronous>, transform_indices = @transform_1, window_bounds = array<i64: 256, 256>}, {pipeline_mode = #tpu.pipeline_mode<synchronous>, transform_indices = @transform_2, window_bounds = array<i64: 1, 256>}, {pipeline_mode = #tpu.pipeline_mode<synchronous>, transform_indices = @transform_3, window_bounds = array<i64: 256, 256>}, {pipeline_mode = #tpu.pipeline_mode<synchronous>, transform_indices = @transform_4, window_bounds = array<i64: 1, 256>}, {transform_indices = @transform_5, window_bounds = array<i64: 256, 256>}]} {
    %c0 = arith.constant 0 : index
    %c0_0 = arith.constant 0 : index
    %0 = vector.load %arg1[%c0, %c0_0] : memref<256x256xf32, #tpu.memory_space<vmem>>, vector<256x256xf32>
    %c0_1 = arith.constant 0 : index
    %c0_2 = arith.constant 0 : index
    %1 = vector.load %arg2[%c0_1, %c0_2] : memref<256x256xf32, #tpu.memory_space<vmem>>, vector<256x256xf32>
    %cst = arith.constant dense<0.000000e+00> : vector<256x256xf32>
    %2 = tpu.matmul %0, %1, %cst {dimension_numbers = #tpu.dot_dimension_numbers<[1], [0], [0], [1], [0, 0, 1, 1], [], []>} : vector<256x256xf32>, vector<256x256xf32>, vector<256x256xf32> -> vector<256x256xf32>
    %c0_3 = arith.constant 0 : index
    %c0_4 = arith.constant 0 : index
    %3 = vector.load %arg3[%c0_3, %c0_4] : memref<1x256xf32, #tpu.memory_space<vmem>>, vector<1x256xf32>
    %4 = vector.broadcast %3 : vector<1x256xf32> to vector<256x256xf32>
    %5 = arith.addf %2, %4 : vector<256x256xf32>
    %cst_5 = arith.constant 0.000000e+00 : f32
    %6 = vector.broadcast %cst_5 : f32 to vector<256x256xf32>
    %7 = arith.maximumf %5, %6 : vector<256x256xf32>
    %c0_6 = arith.constant 0 : index
    %c0_7 = arith.constant 0 : index
    %8 = vector.load %arg4[%c0_6, %c0_7] : memref<256x256xf32, #tpu.memory_space<vmem>>, vector<256x256xf32>
    %cst_8 = arith.constant dense<0.000000e+00> : vector<256x256xf32>
    %9 = tpu.matmul %7, %8, %cst_8 {dimension_numbers = #tpu.dot_dimension_numbers<[1], [0], [0], [1], [0, 0, 1, 1], [], []>} : vector<256x256xf32>, vector<256x256xf32>, vector<256x256xf32> -> vector<256x256xf32>
    %c0_9 = arith.constant 0 : index
    %c0_10 = arith.constant 0 : index
    %10 = vector.load %arg5[%c0_9, %c0_10] : memref<1x256xf32, #tpu.memory_space<vmem>>, vector<1x256xf32>
    %11 = vector.broadcast %10 : vector<1x256xf32> to vector<256x256xf32>
    %12 = arith.addf %9, %11 : vector<256x256xf32>
    %cst_11 = arith.constant 0.000000e+00 : f32
    %13 = vector.broadcast %cst_11 : f32 to vector<256x256xf32>
    %14 = arith.maximumf %12, %13 : vector<256x256xf32>
    %c0_12 = arith.constant 0 : index
    %c0_13 = arith.constant 0 : index
    %15 = vector.load %arg4[%c0_12, %c0_13] : memref<256x256xf32, #tpu.memory_space<vmem>>, vector<256x256xf32>
    %cst_14 = arith.constant dense<0.000000e+00> : vector<256x256xf32>
    %16 = tpu.matmul %14, %15, %cst_14 {dimension_numbers = #tpu.dot_dimension_numbers<[1], [0], [0], [1], [0, 0, 1, 1], [], []>} : vector<256x256xf32>, vector<256x256xf32>, vector<256x256xf32> -> vector<256x256xf32>
    %c0_15 = arith.constant 0 : index
    %c0_16 = arith.constant 0 : index
    %17 = vector.load %arg5[%c0_15, %c0_16] : memref<1x256xf32, #tpu.memory_space<vmem>>, vector<1x256xf32>
    %18 = vector.broadcast %17 : vector<1x256xf32> to vector<256x256xf32>
    %19 = arith.addf %16, %18 : vector<256x256xf32>
    %cst_17 = arith.constant 0.000000e+00 : f32
    %20 = vector.broadcast %cst_17 : f32 to vector<256x256xf32>
    %21 = arith.maximumf %19, %20 : vector<256x256xf32>
    %22 = arith.mulf %21, %21 : vector<256x256xf32>
    %cst_18 = arith.constant dense<0.000000e+00> : vector<256xf32>
    %23 = vector.multi_reduction <add>, %22, %cst_18 [1] : vector<256x256xf32> to vector<256xf32>
    %24 = vector.shape_cast %23 : vector<256xf32> to vector<256x1xf32>
    %cst_19 = arith.constant 1.000000e-24 : f32
    %25 = vector.broadcast %cst_19 : f32 to vector<256x1xf32>
    %26 = arith.maximumf %24, %25 : vector<256x1xf32>
    %27 = math.rsqrt %26 : vector<256x1xf32>
    %28 = vector.broadcast %27 : vector<256x1xf32> to vector<256x256xf32>
    %29 = arith.mulf %21, %28 : vector<256x256xf32>
    %c0_20 = arith.constant 0 : index
    %c0_21 = arith.constant 0 : index
    %30 = vector.load %arg6[%c0_20, %c0_21] : memref<256x256xf32, #tpu.memory_space<vmem>>, vector<256x256xf32>
    tpu.vector_store %arg6[%c0_20, %c0_21], %29 {strides = array<i32>} : memref<256x256xf32, #tpu.memory_space<vmem>>, vector<256x256xf32>,
    return
  }
  func.func @transform_0(%arg0: i32) -> (i32, i32) {
    %c0_i32 = arith.constant 0 : i32
    %c0_i32_0 = arith.constant 0 : i32
    return %arg0, %c0_i32 : i32, i32
  }
  func.func @transform_1(%arg0: i32) -> (i32, i32) {
    %c0_i32 = arith.constant 0 : i32
    %c0_i32_0 = arith.constant 0 : i32
    %c0_i32_1 = arith.constant 0 : i32
    return %c0_i32, %c0_i32_0 : i32, i32
  }
  func.func @transform_2(%arg0: i32) -> (i32, i32) {
    %c0_i32 = arith.constant 0 : i32
    %c0_i32_0 = arith.constant 0 : i32
    %c0_i32_1 = arith.constant 0 : i32
    return %c0_i32, %c0_i32_0 : i32, i32
  }
  func.func @transform_3(%arg0: i32) -> (i32, i32) {
    %c0_i32 = arith.constant 0 : i32
    %c0_i32_0 = arith.constant 0 : i32
    %c0_i32_1 = arith.constant 0 : i32
    return %c0_i32, %c0_i32_0 : i32, i32
  }
  func.func @transform_4(%arg0: i32) -> (i32, i32) {
    %c0_i32 = arith.constant 0 : i32
    %c0_i32_0 = arith.constant 0 : i32
    %c0_i32_1 = arith.constant 0 : i32
    return %c0_i32, %c0_i32_0 : i32, i32
  }
  func.func @transform_5(%arg0: i32) -> (i32, i32) {
    %c0_i32 = arith.constant 0 : i32
    %c0_i32_0 = arith.constant 0 : i32
    return %arg0, %c0_i32 : i32, i32
  }
}

</mosaic_0001>

<bundles_post_ra>
// kernel: procnncl_forward.1
= control target key start
LH: loop header
LB: loop body
LE: loop exit
PB: predicated region body
PF: predicated region fallthrough
CT: control target
= control target key end

     0   :  { %10 = vsyncpa [#allocation3], 0  ;;  %s3506_s0 = inlined_call_operand.hbm [shape: f32[512,256], index: 0, kind: input, shape index: {}]   ;;  %s3507_s1 = inlined_call_operand.hbm [shape: f32[256,256], index: 1, kind: input, shape index: {}]   ;;  %s3508_s2 = inlined_call_operand.vmem [shape: f32[1,256], index: 2, kind: input, shape index: {}]   ;;  %s3509_s3 = inlined_call_operand.hbm [shape: f32[256,256], index: 3, kind: input, shape index: {}]   ;;  %s3510_s4 = inlined_call_operand.vmem [shape: f32[1,256], index: 4, kind: input, shape index: {}]   ;;  %s3511_s5 = inlined_call_operand.hbm [shape: f32[512,256], index: 5, kind: output, shape index: {}]  }
   0x1   :  { %12 = vsyncpa [#allocation3 + $0x1], 0 }
   0x2   :  { %13 = vsyncpa [#allocation6], 0 }
   0x3   :  { %14 = vsyncpa [#allocation4], 0 }
   0x4   :  { %16 = vsyncpa [#allocation4 + $0x1], 0  ;;  %s2492_s18 = smov 0   ;;  %s2494_s19 = smov 0  }
   0x5   :  { %s2496_s20 = smov 0   ;;  %s2498_s21 = smov 0  }
   0x6 LB: > { %s2513_s22 = sadd.s32 4294967295, %s2452_s21   ;;  %s1913_s23 = sadd.s32 4294967294, %s2452_s21   ;;  %s2452_s21 = sphi %s2498_s21, %s3576_s21   ;;  %s2448_s20 = sphi %s2496_s20, %s3575_s20   ;;  %s2444_s19 = sphi %s2494_s19, %s3574_s19   ;;  %s2440_s18 = sphi %s2492_s18, %s3573_s18  }
   0x7   : > { %p42_p0 = scmp.ne.s32.totalorder %s2444_s19, %s2440_s18  ;;  %p3512_p1 = scmp.eq.s32.totalorder %s2513_s22, 0 }
   0x8   : > { %p156_p3 = scmp.eq.s32.totalorder %s1913_s23, 1  ;;  %p1914_p5 = scmp.ge.s32.totalorder %s2452_s21, 1 }
   0x9   : > { %p2522_p4 = por %p3512_p1, %p42_p0  ;;  %p163_p7 = scmp.lt.s32.totalorder %s2452_s21, 3 }
   0xa   : > { %p2527_p6 = por %p156_p3, %p42_p0  ;;  %s2454_s27 = smov [#allocation5]  }
   0xb   : > { %s3530_s24 = scalar_select %p2522_p4, 1, 0 }
   0xc   : > { %s3531_s25 = scalar_select %p2527_p6, 1, 0 }
   0xd   : > { %p2532_p8 = pnand %p1914_p5, %p163_p7  ;;  %s175_s28 = sshll.u32 %s2454_s27, 4  ;;  %s2536_s28 = int_to_ptr.vmem [resolvable:$true] %s175_s28 }
   0xe   : > { %s2455_s30 = smov [#allocation7]   ;;  %s2296_s9 = scalar_lea.hbm %s3507_s1, 8192 }
   0xf   : > { %p2173_p9 = pneg %p2532_p8  ;;  %s191_s6 = sshll.u32 %s2455_s30, 4  ;;  %s2547_s6 = int_to_ptr.vmem [resolvable:$true] %s191_s6 }
  0x10   : > { %p2297_p12 = scmp.ne.s32.totalorder %s3507_s1, %s2296_s9  ;;  %p2303_p5 = scmp.lt.u32.totalorder %s2296_s9, %s3507_s1 }
  0x11   : > { %p2543_p11 = pnand %p2173_p9, %p3512_p1 }
  0x13   : > { %p2298_p13 = pneg %p2543_p11 }
  0x15   : > { %p2299_p0 = pnand %p2298_p13, %p2297_p12 }
  0x17   : > { %p2300_p3 = pneg %p2299_p0 }
  0x19   : > { %p2305_p7 = pnand %p2303_p5, %p2300_p3 }
  0x1b   : > { %2308 = shalt.err (!%p2305_p7)
}
  0x1c   : > { %s2309_s14 = scalar_lea.vmem %s2536_s28, 8192  ;;  %p2317_p2 = scmp.lt.s32.totalorder %s2536_s28, %s2536_s28 }
  0x1d   : > { %p2310_p9 = scmp.ne.s32.totalorder %s2536_s28, %s2309_s14  ;;  %p2318_p12 = scmp.lt.s32.totalorder %s2309_s14, %s2309_s14 }
  0x1f   : > { %p2312_p10 = pnand %p2310_p9, %p2298_p13  ;;  %p2319_p0 = por %p2318_p12, %p2317_p2 }
  0x21   : > { %p2313_p1 = pneg %p2312_p10 }
  0x23   : > { %p2320_p6 = pnand %p2319_p0, %p2313_p1 }
  0x25   : > { %2323 = shalt.err (!%p2320_p6)
}
  0x26   : > { %s2456_s15 = smov 256   ;;  %s2457_s16 = smov 16  }
  0x27   : > { %2176 = dma.hbm_to_vmem [thread:$0]  (!%p2543_p11), %s3507_s1, 8192, %s2536_s28, [#allocation6], %s2456_s15, %s2456_s15, %s2457_s16  }
  0x28   : > { %s2324_s7 = scalar_lea.hbm %s3509_s3, 8192 }
  0x29   : > { %p2325_p1 = scmp.ne.s32.totalorder %s3509_s3, %s2324_s7  ;;  %p2331_p10 = scmp.lt.u32.totalorder %s2324_s7, %s3509_s3 }
  0x2b   : > { %p2327_p2 = pnand %p2325_p1, %p2298_p13 }
  0x2d   : > { %p2328_p6 = pneg %p2327_p2 }
  0x2f   : > { %p2333_p3 = pnand %p2331_p10, %p2328_p6 }
  0x31   : > { %2336 = shalt.err (!%p2333_p3)
}
  0x32   : > { %s2337_s28 = scalar_lea.vmem %s2547_s6, 8192  ;;  %p2345_p12 = scmp.lt.s32.totalorder %s2547_s6, %s2547_s6 }
  0x33   : > { %p2338_p5 = scmp.ne.s32.totalorder %s2547_s6, %s2337_s28  ;;  %p2346_p0 = scmp.lt.s32.totalorder %s2337_s28, %s2337_s28 }
  0x35   : > { %p2340_p7 = pnand %p2338_p5, %p2298_p13  ;;  %p2347_p1 = por %p2346_p0, %p2345_p12 }
  0x37   : > { %p2341_p9 = pneg %p2340_p7 }
  0x39   : > { %p2348_p2 = pnand %p2347_p1, %p2341_p9 }
  0x3b   : > { %2351 = shalt.err (!%p2348_p2)
}
  0x3c   : > { %2179 = dma.hbm_to_vmem [thread:$0]  (!%p2543_p11), %s3509_s3, 8192, %s2547_s6, [#allocation6], %s2456_s15, %s2456_s15, %s2457_s16  }
  0x3d   : > { %s2608_s29 = sadd.s32 1, %s2452_s21   ;;  %s29_s14 = sadd.s32 1, %s2448_s20 }
  0x3e   : > { %s26_s17 = ssub.s32 %s2452_s21, %s2608_s29  ;;  %p36_p13 = scmp.ne.s32.totalorder %s2448_s20, %s2444_s19 }
  0x3f   : > { %p27_p6 = scmp.eq.s32.totalorder %s26_s17, 0  ;;  %p37_p10 = scmp.eq.s32.totalorder %s2452_s21, 0 }
  0x40   : > { %p3534_p3 = scmp.eq.s32.totalorder %s2513_s22, 1  ;;  %p2190_p7 = scmp.lt.s32.totalorder %s2452_s21, 2 }
  0x41   : > { %s2624_s27 = scalar_select %p27_p6, %s2448_s20, %s29_s14  }
  0x42   : > { %p2618_p5 = por %p3534_p3, %p36_p13  ;;  %p38_p9 = por %p37_p10, %p36_p13 }
  0x43   : > { %s208_s30 = sand.u32 1, %s2448_s20   ;;  %s1934_s6 = sshll.u32 %s2452_s21, 13 }
  0x44   : > { %s3535_s23 = scalar_select %p2618_p5, 1, 0 }
  0x45   : > { %s1918_s7 = sshll.u32 %s208_s30, 9  ;;  %s2631_s10 = scalar_lea.hbm %s3506_s0, %s1934_s6 }
  0x46   : > { %s212_s11 = scalar_lea.vmem [#allocation2], %s1918_s7  ;;  %p2635_p11 = pnand %p2190_p7, %p38_p9 }
  0x47   : > { %s220_s28 = sshll.u32 %s212_s11, 4  ;;  %s2639_s13 = scalar_lea.sflag [#allocation3], %s208_s30  ;;  %s2633_s28 = int_to_ptr.vmem [resolvable:$true] %s220_s28 }
  0x48   : > { %s2352_s14 = scalar_lea.hbm %s2631_s10, 8192  ;;  %p2354_p0 = pneg %p2635_p11 }
  0x49   : > { %p2353_p12 = scmp.ne.s32.totalorder %s2631_s10, %s2352_s14  ;;  %s2357_s6 = scalar_lea.hbm %s3506_s0, 16384 }
  0x4a   : > { %p2358_p13 = scmp.lt.u32.totalorder %s2631_s10, %s3506_s0  ;;  %p2359_p6 = scmp.lt.u32.totalorder %s2357_s6, %s2352_s14 }
  0x4b   : > { %p2355_p1 = pnand %p2354_p0, %p2353_p12  ;;  %p2361_p3 = scmp.lt.u32.totalorder %s2352_s14, %s2631_s10 }
  0x4c   : > { %p2360_p10 = por %p2359_p6, %p2358_p13 }
  0x4d   : > { %p2356_p2 = pneg %p2355_p1 }
  0x4e   : > { %p2362_p7 = por %p2361_p3, %p2360_p10 }
  0x50   : > { %p2363_p9 = pnand %p2362_p7, %p2356_p2 }
  0x52   : > { %2366 = shalt.err (!%p2363_p9)
}
  0x53   : > { %s2367_s30 = scalar_lea.vmem %s2633_s28, 8192  ;;  %s2458_s11 = smov [#allocation2]  }
  0x54   : > { %p2368_p12 = scmp.ne.s32.totalorder %s2633_s28, %s2367_s30  ;;  %s2372_s17 = sshll.u32 %s2458_s11, 4  ;;  %s2373_s17 = int_to_ptr.vmem [resolvable:$false] %s2372_s17 }
  0x55   : > { %s2374_s7 = scalar_lea.vmem %s2373_s17, 16384  ;;  %p2375_p4 = scmp.lt.s32.totalorder %s2633_s28, %s2373_s17 }
  0x56   : > { %p2370_p1 = pnand %p2368_p12, %p2354_p0  ;;  %p2376_p13 = scmp.lt.s32.totalorder %s2374_s7, %s2367_s30 }
  0x58   : > { %p2371_p5 = pneg %p2370_p1  ;;  %p2377_p6 = por %p2376_p13, %p2375_p4 }
  0x5a   : > { %p2378_p10 = pnand %p2377_p6, %p2371_p5 }
  0x5c   : > { %2381 = shalt.err (!%p2378_p10)
}
  0x5d   : > { %2183 = dma.hbm_to_vmem [thread:$0]  (!%p2635_p11), %s2631_s10, 8192, %s2633_s28, %s2639_s13, %s2456_s15, %s2456_s15, %s2457_s16  }
  0x5e   : > { %232 = sbr.rel (%p2532_p8) target bundleno = 1128 (0x468), region = 40 }
  0x65   : > { %s2673_s14 = sand.u32 1, %s2444_s19   ;;  %p3537_p4 = scmp.ne.s32.totalorder %s3530_s24, 0 }
  0x66   : > { %s1923_s6 = sshll.u32 %s2673_s14, 9  ;;  %s235_s8 = scalar_lea.sflag [#allocation3], %s2673_s14 }
  0x67   : > { %s2679_s12 = scalar_lea.vmem [#allocation2], %s1923_s6 }
  0x68   : > { %2427 = dma.done.wait (%p3537_p4), %s235_s8, 8192  }
  0x69   : > { %2429 = vsyncadd (%p3537_p4), %s235_s8, 4294959104  ;;  %p3538_p5 = scmp.eq.s32.totalorder %s2513_s22, 0 }
  0x6b   : > { %2431 = dma.done.wait (%p3538_p5), [#allocation6], 16384   ;;  %p3539_p8 = pmov %p3538_p5 }
  0x6c   : > { %v340_v0 = vld [vmem:[#allocation5 + $0x8] sm:$0xff]  ;;  %v342_v1 = vld [vmem:[#allocation5 + $0x18] sm:$0xff]  ;;  %v339_v2 = vld [vmem:[#allocation5] sm:$0xff]  ;;  %s3327_s10 = scalar_lea.vmem [#allocation8], %s1923_s6  ;;  %s1936_s28 = sshll.u32 %s2513_s22, 13 }
  0x6d   : > { %2433 = vsyncadd (%p3539_p8), [#allocation6], 4294950912  ;;  %v1937_v3 = vpack.c.bf16 %v342_v1, %v340_v0  ;;  %v341_v4 = vld [vmem:[#allocation5 + $0x10] sm:$0xff]  ;;  %v344_v5 = vld [vmem:[#allocation5 + $0x28] sm:$0xff]  ;;  %s1821_s13 = sshll.u32 %s3327_s10, 4  ;;  %s3456_s11 = scalar_lea.hbm %s3511_s5, %s1936_s28  ;;  %s3458_s13 = int_to_ptr.vmem [resolvable:$true] %s1821_s13 }
  0x6e   : > { %v346_v6 = vld [vmem:[#allocation5 + $0x38] sm:$0xff]  ;;  %v1939_v7 = vpack.c.bf16 %v341_v4, %v339_v2  ;;  %v343_v9 = vld [vmem:[#allocation5 + $0x20] sm:$0xff]  ;;  %v345_v10 = vld [vmem:[#allocation5 + $0x30] sm:$0xff]  ;;  %s1807_s22 = scalar_lea.sflag [#allocation4], %s2673_s14  ;;  %s2382_s17 = scalar_lea.vmem %s3458_s13, 8192 }
  0x6f   : > { %v1941_v8 = vpack.c.bf16 %v346_v6, %v344_v5  ;;  %v348_v11 = vld [vmem:[#allocation5 + $0x48] sm:$0xff]  ;;  %1938 = vmatprep.subr.bf16.mxu0 %v1937_v3  ;;  %v350_v12 = vld [vmem:[#allocation5 + $0x58] sm:$0xff]  ;;  %2129 = vmatprep.subr.bf16.mxu1 %v1937_v3  ;;  %v1943_v13 = vpack.c.bf16 %v345_v10, %v343_v9  ;;  %v347_v15 = vld [vmem:[#allocation5 + $0x40] sm:$0xff]  ;;  %p2383_p11 = scmp.ne.s32.totalorder %s3458_s13, %s2382_s17  ;;  %p3570_p0 = scmp.ne.s32.totalorder %s3535_s23, 0 }
  0x70   : > { %1940 = vmatpush1.bf16.msra.mxu0 %v1939_v7  ;;  %2145 = vmatpush1.bf16.msra.mxu1 %v1939_v7  ;;  %v1945_v14 = vpack.c.bf16 %v350_v12, %v348_v11  ;;  %v349_v16 = vld [vmem:[#allocation5 + $0x50] sm:$0xff]  ;;  %v352_v17 = vld [vmem:[#allocation5 + $0x68] sm:$0xff]  ;;  %v354_v18 = vld [vmem:[#allocation5 + $0x78] sm:$0xff]  ;;  %s2459_s7 = smov [#allocation8]  }
  0x71   : > { %1942 = vmatprep.subr.bf16.mxu0 %v1941_v8  ;;  %2130 = vmatprep.subr.bf16.mxu1 %v1941_v8  ;;  %v1947_v19 = vpack.c.bf16 %v349_v16, %v347_v15  ;;  %v1949_v20 = vpack.c.bf16 %v354_v18, %v352_v17  ;;  %v351_v21 = vld [vmem:[#allocation5 + $0x60] sm:$0xff]  ;;  %v353_v22 = vld [vmem:[#allocation5 + $0x70] sm:$0xff]  ;;  %v356_v23 = vld [vmem:[#allocation5 + $0x88] sm:$0xff]  ;;  %p2384_p2 = pnand %p2383_p11, %p3570_p0  ;;  %s2386_s6 = sshll.u32 %s2459_s7, 4  ;;  %s2387_s6 = int_to_ptr.vmem [resolvable:$false] %s2386_s6 }
  0x72   : > { %v358_v24 = vld [vmem:[#allocation5 + $0x98] sm:$0xff]  ;;  %v1951_v25 = vpack.c.bf16 %v353_v22, %v351_v21  ;;  %v355_v27 = vld [vmem:[#allocation5 + $0x80] sm:$0xff]  ;;  %v357_v28 = vld [vmem:[#allocation5 + $0x90] sm:$0xff]  ;;  %s2388_s8 = scalar_lea.vmem %s2387_s6, 16384  ;;  %p2389_p7 = scmp.lt.s32.totalorder %s3458_s13, %s2387_s6 }
  0x73   : > { %v1953_v26 = vpack.c.bf16 %v358_v24, %v356_v23  ;;  %v360_v29 = vld [vmem:[#allocation5 + $0xa8] sm:$0xff]  ;;  %v362_v30 = vld [vmem:[#allocation5 + $0xb8] sm:$0xff]  ;;  %v1955_v31 = vpack.c.bf16 %v357_v28, %v355_v27  ;;  %v359_v33 = vld [vmem:[#allocation5 + $0xa0] sm:$0xff]  ;;  %p2385_p3 = pneg %p2384_p2  ;;  %p2390_p9 = scmp.lt.s32.totalorder %s2388_s8, %s2382_s17 }
  0x74   : > { %1944 = vmatpush1.bf16.msra.mxu0 %v1943_v13  ;;  %2146 = vmatpush1.bf16.msra.mxu1 %v1943_v13  ;;  %v1957_v32 = vpack.c.bf16 %v362_v30, %v360_v29  ;;  %v361_v34 = vld [vmem:[#allocation5 + $0xb0] sm:$0xff]  ;;  %v364_v35 = vld [vmem:[#allocation5 + $0xc8] sm:$0xff]  ;;  %v366_v36 = vld [vmem:[#allocation5 + $0xd8] sm:$0xff] }
  0x75   : > { %1946 = vmatprep.subr.bf16.mxu0 %v1945_v14  ;;  %2131 = vmatprep.subr.bf16.mxu1 %v1945_v14  ;;  %v1959_v37 = vpack.c.bf16 %v361_v34, %v359_v33  ;;  %v1961_v38 = vpack.c.bf16 %v366_v36, %v364_v35  ;;  %v363_v39 = vld [vmem:[#allocation5 + $0xc0] sm:$0xff]  ;;  %v365_v40 = vld [vmem:[#allocation5 + $0xd0] sm:$0xff]  ;;  %v276_v41 = vld [vmem:[%s2679_s12 + $0x8] sm:$0xff]  ;;  %p2391_p12 = por %p2390_p9, %p2389_p7 }
  0x76   : > { %v368_v42 = vld [vmem:[#allocation5 + $0xe8] sm:$0xff]  ;;  %v370_v43 = vld [vmem:[#allocation5 + $0xf8] sm:$0xff]  ;;  %479 = vmatprep.mubr.f32.mxu0 %v276_v41  ;;  %v1963_v44 = vpack.c.bf16 %v365_v40, %v363_v39  ;;  %v367_v46 = vld [vmem:[#allocation5 + $0xe0] sm:$0xff] }
  0x77   : > { %v1965_v45 = vpack.c.bf16 %v370_v43, %v368_v42  ;;  %v369_v47 = vld [vmem:[#allocation5 + $0xf0] sm:$0xff]  ;;  %v372_v48 = vld [vmem:[#allocation5 + $0x108] sm:$0xff]  ;;  %v374_v49 = vld [vmem:[#allocation5 + $0x118] sm:$0xff]  ;;  %p2392_p1 = pnand %p2391_p12, %p2385_p3 }
  0x78   : > { %1948 = vmatpush1.bf16.msra.mxu0 %v1947_v19  ;;  %2147 = vmatpush1.bf16.msra.mxu1 %v1947_v19  ;;  %v1967_v50 = vpack.c.bf16 %v369_v47, %v367_v46  ;;  %v1969_v51 = vpack.c.bf16 %v374_v49, %v372_v48  ;;  %v371_v52 = vld [vmem:[#allocation5 + $0x100] sm:$0xff]  ;;  %v373_v53 = vld [vmem:[#allocation5 + $0x110] sm:$0xff]  ;;  %v376_v54 = vld [vmem:[#allocation5 + $0x128] sm:$0xff] }
  0x79   : > { %1950 = vmatprep.subr.bf16.mxu0 %v1949_v20  ;;  %2132 = vmatprep.subr.bf16.mxu1 %v1949_v20  ;;  %v378_v55 = vld [vmem:[#allocation5 + $0x138] sm:$0xff]  ;;  %v1971_v56 = vpack.c.bf16 %v373_v53, %v371_v52  ;;  %v308_v57 = vld [vmem:[%s2679_s12 + $0x108] sm:$0xff]  ;;  %v375_v59 = vld [vmem:[#allocation5 + $0x120] sm:$0xff] }
  0x7a   : > { %v1973_v58 = vpack.c.bf16 %v378_v55, %v376_v54  ;;  %v377_v60 = vld [vmem:[#allocation5 + $0x130] sm:$0xff]  ;;  %v380_v61 = vld [vmem:[#allocation5 + $0x148] sm:$0xff]  ;;  %v382_v62 = vld [vmem:[#allocation5 + $0x158] sm:$0xff]  ;;  %575 = vmatprep.mubr.f32.mxu1 %v308_v57 }
  0x7b   : > { %v1975_v63 = vpack.c.bf16 %v377_v60, %v375_v59  ;;  %v1977_v0 = vpack.c.bf16 %v382_v62, %v380_v61  ;;  %v379_v1 = vld [vmem:[#allocation5 + $0x140] sm:$0xff]  ;;  %v381_v2 = vld [vmem:[#allocation5 + $0x150] sm:$0xff]  ;;  %v384_v3 = vld [vmem:[#allocation5 + $0x168] sm:$0xff] }
  0x7c   : > { %1952 = vmatpush1.bf16.msra.mxu0 %v1951_v25  ;;  %2148 = vmatpush1.bf16.msra.mxu1 %v1951_v25  ;;  %v386_v4 = vld [vmem:[#allocation5 + $0x178] sm:$0xff]  ;;  %v1979_v5 = vpack.c.bf16 %v381_v2, %v379_v1  ;;  %v383_v7 = vld [vmem:[#allocation5 + $0x160] sm:$0xff]  ;;  %v385_v8 = vld [vmem:[#allocation5 + $0x170] sm:$0xff] }
  0x7d   : > { %1954 = vmatprep.subr.bf16.mxu0 %v1953_v26  ;;  %2133 = vmatprep.subr.bf16.mxu1 %v1953_v26  ;;  %v1981_v6 = vpack.c.bf16 %v386_v4, %v384_v3  ;;  %v388_v9 = vld [vmem:[#allocation5 + $0x188] sm:$0xff]  ;;  %v390_v10 = vld [vmem:[#allocation5 + $0x198] sm:$0xff]  ;;  %v1983_v11 = vpack.c.bf16 %v385_v8, %v383_v7  ;;  %v387_v13 = vld [vmem:[#allocation5 + $0x180] sm:$0xff] }
  0x7e   : > { %v1985_v12 = vpack.c.bf16 %v390_v10, %v388_v9  ;;  %v389_v14 = vld [vmem:[#allocation5 + $0x190] sm:$0xff]  ;;  %v392_v15 = vld [vmem:[#allocation5 + $0x1a8] sm:$0xff]  ;;  %v394_v16 = vld [vmem:[#allocation5 + $0x1b8] sm:$0xff] }
  0x7f   : > { %v1987_v17 = vpack.c.bf16 %v389_v14, %v387_v13  ;;  %v1989_v18 = vpack.c.bf16 %v394_v16, %v392_v15  ;;  %v391_v19 = vld [vmem:[#allocation5 + $0x1a0] sm:$0xff]  ;;  %v393_v20 = vld [vmem:[#allocation5 + $0x1b0] sm:$0xff]  ;;  %v396_v21 = vld [vmem:[#allocation5 + $0x1c8] sm:$0xff] }
  0x80   : > { %1956 = vmatpush1.bf16.msra.mxu0 %v1955_v31  ;;  %2149 = vmatpush1.bf16.msra.mxu1 %v1955_v31  ;;  %v398_v22 = vld [vmem:[#allocation5 + $0x1d8] sm:$0xff]  ;;  %v1991_v23 = vpack.c.bf16 %v393_v20, %v391_v19  ;;  %v395_v25 = vld [vmem:[#allocation5 + $0x1c0] sm:$0xff]  ;;  %v397_v26 = vld [vmem:[#allocation5 + $0x1d0] sm:$0xff] }
  0x81   : > { %1958 = vmatprep.subr.bf16.mxu0 %v1957_v32  ;;  %2134 = vmatprep.subr.bf16.mxu1 %v1957_v32  ;;  %v1993_v24 = vpack.c.bf16 %v398_v22, %v396_v21  ;;  %v400_v27 = vld [vmem:[#allocation5 + $0x1e8] sm:$0xff]  ;;  %v402_v28 = vld [vmem:[#allocation5 + $0x1f8] sm:$0xff]  ;;  %v1995_v29 = vpack.c.bf16 %v397_v26, %v395_v25  ;;  %v399_v31 = vld [vmem:[#allocation5 + $0x1e0] sm:$0xff] }
  0x82   : > { %v1997_v30 = vpack.c.bf16 %v402_v28, %v400_v27  ;;  %v401_v32 = vld [vmem:[#allocation5 + $0x1f0] sm:$0xff]  ;;  %v737_v33 = vld [vmem:[#allocation7 + $0x8] sm:$0xff]  ;;  %v739_v34 = vld [vmem:[#allocation7 + $0x18] sm:$0xff] }
  0x83   : > { %v1999_v35 = vpack.c.bf16 %v401_v32, %v399_v31  ;;  %v2001_v36 = vpack.c.bf16 %v739_v34, %v737_v33  ;;  %v741_v39 = vld [vmem:[#allocation7 + $0x28] sm:$0xff]  ;;  %v743_v40 = vld [vmem:[#allocation7 + $0x38] sm:$0xff]  ;;  %v275_v41 = vld [vmem:[%s2679_s12] sm:$0xff] }
  0x84   : > { %1960 = vmatpush1.bf16.msra.mxu0 %v1959_v37  ;;  %2150 = vmatpush1.bf16.msra.mxu1 %v1959_v37  ;;  %v736_v37 = vld [vmem:[#allocation7] sm:$0xff]  ;;  %v278_v43 = vld [vmem:[%s2679_s12 + $0x18] sm:$0xff]  ;;  %v2005_v46 = vpack.c.bf16 %v743_v40, %v741_v39  ;;  %v742_v48 = vld [vmem:[#allocation7 + $0x30] sm:$0xff] }
  0x85   : > { %1962 = vmatprep.subr.bf16.mxu0 %v1961_v38  ;;  %2135 = vmatprep.subr.bf16.mxu1 %v1961_v38  ;;  %v738_v38 = vld [vmem:[#allocation7 + $0x10] sm:$0xff]  ;;  %v307_v42 = vld [vmem:[%s2679_s12 + $0x100] sm:$0xff]  ;;  %v745_v49 = vld [vmem:[#allocation7 + $0x48] sm:$0xff] }
  0x86   : > { %v740_v47 = vld [vmem:[#allocation7 + $0x20] sm:$0xff]  ;;  %v309_v52 = vld [vmem:[%s2679_s12 + $0x110] sm:$0xff]  ;;  %v280_v53 = vld [vmem:[%s2679_s12 + $0x28] sm:$0xff] }
  0x87   : > { %v312_v54 = vld [vmem:[%s2679_s12 + $0x128] sm:$0xff]  ;;  %v2007_v55 = vpack.c.bf16 %v742_v48, %v740_v47  ;;  %v744_v57 = vld [vmem:[#allocation7 + $0x40] sm:$0xff]  ;;  %v751_v60 = vld [vmem:[#allocation7 + $0x78] sm:$0xff] }
  0x88   : > { %1964 = vmatpush1.bf16.msra.mxu0 %v1963_v44  ;;  %2151 = vmatpush1.bf16.msra.mxu1 %v1963_v44  ;;  %v310_v44 = vld [vmem:[%s2679_s12 + $0x118] sm:$0xff]  ;;  %v749_v59 = vld [vmem:[#allocation7 + $0x68] sm:$0xff]  ;;  %v279_v61 = vld [vmem:[%s2679_s12 + $0x20] sm:$0xff] }
  0x89   : > { %1966 = vmatprep.subr.bf16.mxu0 %v1965_v45  ;;  %2136 = vmatprep.subr.bf16.mxu1 %v1965_v45  ;;  %v2003_v45 = vpack.c.bf16 %v738_v38, %v736_v37  ;;  %v311_v62 = vld [vmem:[%s2679_s12 + $0x120] sm:$0xff]  ;;  %v2013_v2 = vpack.c.bf16 %v751_v60, %v749_v59  ;;  %v750_v4 = vld [vmem:[#allocation7 + $0x70] sm:$0xff]  ;;  %v284_v9 = vld [vmem:[%s2679_s12 + $0x48] sm:$0xff] }
  0x8a   : > { %v748_v3 = vld [vmem:[#allocation7 + $0x60] sm:$0xff]  ;;  %v281_v7 = vld [vmem:[%s2679_s12 + $0x30] sm:$0xff]  ;;  %v316_v10 = vld [vmem:[%s2679_s12 + $0x148] sm:$0xff] }
  0x8b   : > { %v313_v8 = vld [vmem:[%s2679_s12 + $0x130] sm:$0xff]  ;;  %v752_v13 = vld [vmem:[#allocation7 + $0x80] sm:$0xff]  ;;  %v757_v15 = vld [vmem:[#allocation7 + $0xa8] sm:$0xff] }
  0x8c   : > { %1968 = vmatpush1.bf16.msra.mxu0 %v1967_v50  ;;  %2152 = vmatpush1.bf16.msra.mxu1 %v1967_v50  ;;  %v747_v50 = vld [vmem:[#allocation7 + $0x58] sm:$0xff]  ;;  %v754_v14 = vld [vmem:[#allocation7 + $0x90] sm:$0xff]  ;;  %v761_v25 = vld [vmem:[#allocation7 + $0xc8] sm:$0xff] }
  0x8d   : > { %1970 = vmatprep.subr.bf16.mxu0 %v1969_v51  ;;  %2137 = vmatprep.subr.bf16.mxu1 %v1969_v51  ;;  %v277_v51 = vld [vmem:[%s2679_s12 + $0x10] sm:$0xff]  ;;  %v759_v16 = vld [vmem:[#allocation7 + $0xb8] sm:$0xff]  ;;  %v2019_v21 = vpack.c.bf16 %v754_v14, %v752_v13  ;;  %v760_v33 = vld [vmem:[#allocation7 + $0xc0] sm:$0xff] }
  0x8e   : > { %v286_v19 = vld [vmem:[%s2679_s12 + $0x58] sm:$0xff]  ;;  %v2021_v22 = vpack.c.bf16 %v759_v16, %v757_v15  ;;  %v285_v27 = vld [vmem:[%s2679_s12 + $0x50] sm:$0xff]  ;;  %v287_v37 = vld [vmem:[%s2679_s12 + $0x60] sm:$0xff] }
  0x8f   : > { %v318_v20 = vld [vmem:[%s2679_s12 + $0x158] sm:$0xff]  ;;  %v317_v28 = vld [vmem:[%s2679_s12 + $0x150] sm:$0xff]  ;;  %v319_v38 = vld [vmem:[%s2679_s12 + $0x160] sm:$0xff] }
  0x90   : > { %1972 = vmatpush1.bf16.msra.mxu0 %v1971_v56  ;;  %2153 = vmatpush1.bf16.msra.mxu1 %v1971_v56  ;;  %v2009_v56 = vpack.c.bf16 %v747_v50, %v745_v49  ;;  %v763_v26 = vld [vmem:[#allocation7 + $0xd8] sm:$0xff]  ;;  %v762_v34 = vld [vmem:[#allocation7 + $0xd0] sm:$0xff]  ;;  %v292_v49 = vld [vmem:[%s2679_s12 + $0x88] sm:$0xff] }
  0x91   : > { %1974 = vmatprep.subr.bf16.mxu0 %v1973_v58  ;;  %2138 = vmatprep.subr.bf16.mxu1 %v1973_v58  ;;  %v746_v58 = vld [vmem:[#allocation7 + $0x50] sm:$0xff]  ;;  %v2025_v32 = vpack.c.bf16 %v763_v26, %v761_v25  ;;  %v290_v39 = vld [vmem:[%s2679_s12 + $0x78] sm:$0xff]  ;;  %v324_v50 = vld [vmem:[%s2679_s12 + $0x188] sm:$0xff] }
  0x92   : > { %v2011_v1 = vpack.c.bf16 %v746_v58, %v744_v57  ;;  %v322_v40 = vld [vmem:[%s2679_s12 + $0x178] sm:$0xff]  ;;  %v289_v47 = vld [vmem:[%s2679_s12 + $0x70] sm:$0xff]  ;;  %v291_v57 = vld [vmem:[%s2679_s12 + $0x80] sm:$0xff] }
  0x93   : > { %v321_v48 = vld [vmem:[%s2679_s12 + $0x170] sm:$0xff]  ;;  %v323_v58 = vld [vmem:[%s2679_s12 + $0x180] sm:$0xff]  ;;  %v294_v59 = vld [vmem:[%s2679_s12 + $0x98] sm:$0xff] }
  0x94   : > { %1976 = vmatpush1.bf16.msra.mxu0 %v1975_v63  ;;  %2154 = vmatpush1.bf16.msra.mxu1 %v1975_v63  ;;  %v282_v63 = vld [vmem:[%s2679_s12 + $0x38] sm:$0xff]  ;;  %v295_v13 = vld [vmem:[%s2679_s12 + $0xa0] sm:$0xff]  ;;  %v300_v25 = vld [vmem:[%s2679_s12 + $0xc8] sm:$0xff] }
  0x95   : > { %1978 = vmatprep.subr.bf16.mxu0 %v1977_v0  ;;  %2139 = vmatprep.subr.bf16.mxu1 %v1977_v0  ;;  %v314_v0 = vld [vmem:[%s2679_s12 + $0x138] sm:$0xff]  ;;  %v327_v14 = vld [vmem:[%s2679_s12 + $0x1a0] sm:$0xff]  ;;  %v332_v26 = vld [vmem:[%s2679_s12 + $0x1c8] sm:$0xff] }
  0x96   : > { %v326_v60 = vld [vmem:[%s2679_s12 + $0x198] sm:$0xff] }
  0x97   : > { %v298_v15 = vld [vmem:[%s2679_s12 + $0xb8] sm:$0xff] }
  0x98   : > { %1980 = vmatpush1.bf16.msra.mxu0 %v1979_v5  ;;  %2155 = vmatpush1.bf16.msra.mxu1 %v1979_v5  ;;  %v753_v5 = vld [vmem:[#allocation7 + $0x88] sm:$0xff]  ;;  %v330_v16 = vld [vmem:[%s2679_s12 + $0x1b8] sm:$0xff] }
  0x99   : > { %1982 = vmatprep.subr.bf16.mxu0 %v1981_v6  ;;  %2140 = vmatprep.subr.bf16.mxu1 %v1981_v6  ;;  %v755_v6 = vld [vmem:[#allocation7 + $0x98] sm:$0xff] }
  0x9c   : > { %1984 = vmatpush1.bf16.msra.mxu0 %v1983_v11  ;;  %2156 = vmatpush1.bf16.msra.mxu1 %v1983_v11  ;;  %v2015_v11 = vpack.c.bf16 %v750_v4, %v748_v3  ;;  %v293_v3 = vld [vmem:[%s2679_s12 + $0x90] sm:$0xff] }
  0x9d   : > { %1986 = vmatprep.subr.bf16.mxu0 %v1985_v12  ;;  %2141 = vmatprep.subr.bf16.mxu1 %v1985_v12  ;;  %v2017_v12 = vpack.c.bf16 %v755_v6, %v753_v5  ;;  %v325_v4 = vld [vmem:[%s2679_s12 + $0x190] sm:$0xff]  ;;  %v296_v5 = vld [vmem:[%s2679_s12 + $0xa8] sm:$0xff] }
  0x9e   : > { %v328_v6 = vld [vmem:[%s2679_s12 + $0x1a8] sm:$0xff] }
  0xa0   : > { %1988 = vmatpush1.bf16.msra.mxu0 %v1987_v17  ;;  %2157 = vmatpush1.bf16.msra.mxu1 %v1987_v17  ;;  %v283_v17 = vld [vmem:[%s2679_s12 + $0x40] sm:$0xff] }
  0xa1   : > { %1990 = vmatprep.subr.bf16.mxu0 %v1989_v18  ;;  %2142 = vmatprep.subr.bf16.mxu1 %v1989_v18  ;;  %v315_v18 = vld [vmem:[%s2679_s12 + $0x140] sm:$0xff] }
  0xa4   : > { %1992 = vmatpush1.bf16.msra.mxu0 %v1991_v23  ;;  %2158 = vmatpush1.bf16.msra.mxu1 %v1991_v23  ;;  %v756_v23 = vld [vmem:[#allocation7 + $0xa0] sm:$0xff] }
  0xa5   : > { %1994 = vmatprep.subr.bf16.mxu0 %v1993_v24  ;;  %2143 = vmatprep.subr.bf16.mxu1 %v1993_v24  ;;  %v758_v24 = vld [vmem:[#allocation7 + $0xb0] sm:$0xff] }
  0xa6   : > { %v2023_v31 = vpack.c.bf16 %v758_v24, %v756_v23  ;;  %v297_v23 = vld [vmem:[%s2679_s12 + $0xb0] sm:$0xff] }
  0xa7   : > { %v329_v24 = vld [vmem:[%s2679_s12 + $0x1b0] sm:$0xff] }
  0xa8   : > { %1996 = vmatpush1.bf16.msra.mxu0 %v1995_v29  ;;  %2159 = vmatpush1.bf16.msra.mxu1 %v1995_v29  ;;  %v288_v29 = vld [vmem:[%s2679_s12 + $0x68] sm:$0xff] }
  0xa9   : > { %1998 = vmatprep.subr.bf16.mxu0 %v1997_v30  ;;  %2144 = vmatprep.subr.bf16.mxu1 %v1997_v30  ;;  %v320_v30 = vld [vmem:[%s2679_s12 + $0x168] sm:$0xff] }
  0xac   : > { %2000 = vmatpush1.bf16.msra.mxu0 %v1999_v35  ;;  %2160 = vmatpush1.bf16.msra.mxu1 %v1999_v35  ;;  %v765_v35 = vld [vmem:[#allocation7 + $0xe8] sm:$0xff] }
  0xad   : > { %2002 = vmatprep.subr.bf16.mxu1 %v2001_v36  ;;  %2066 = vmatprep.subr.bf16.mxu0 %v2001_v36  ;;  %v767_v36 = vld [vmem:[#allocation7 + $0xf8] sm:$0xff] }
  0xaf   : > { %480 = vmatmul.mubr.f32.vlgmr.msra.gmra.mrb[0].mxu0 %v275_v41  ;;  %576 = vmatmul.mubr.f32.vlgmr.msra.gmra.mrb[0].mxu1 %v307_v42  ;;  %v2027_v41 = vpack.c.bf16 %v762_v34, %v760_v33  ;;  %v2029_v42 = vpack.c.bf16 %v767_v36, %v765_v35  ;;  %v299_v33 = vld [vmem:[%s2679_s12 + $0xc0] sm:$0xff]  ;;  %v302_v35 = vld [vmem:[%s2679_s12 + $0xd8] sm:$0xff] }
  0xb0   : > { %485 = vmatprep.mubr.f32.mxu0 %v278_v43  ;;  %581 = vmatprep.mubr.f32.mxu1 %v310_v44  ;;  %v764_v43 = vld [vmem:[#allocation7 + $0xe0] sm:$0xff]  ;;  %v766_v44 = vld [vmem:[#allocation7 + $0xf0] sm:$0xff]  ;;  %v334_v36 = vld [vmem:[%s2679_s12 + $0x1d8] sm:$0xff] }
  0xb1   : > { %2004 = vmatpush1.bf16.msra.mxu1 %v2003_v45  ;;  %2068 = vmatpush1.bf16.msra.mxu0 %v2003_v45  ;;  %v769_v45 = vld [vmem:[#allocation7 + $0x108] sm:$0xff]  ;;  %v331_v34 = vld [vmem:[%s2679_s12 + $0x1c0] sm:$0xff] }
  0xb2   : > { %2006 = vmatprep.subr.bf16.mxu1 %v2005_v46  ;;  %2070 = vmatprep.subr.bf16.mxu0 %v2005_v46  ;;  %v771_v46 = vld [vmem:[#allocation7 + $0x118] sm:$0xff] }
  0xb3   : > { %486 = vmatmul.mubr.f32.gmra.mrb[2].mxu0 %v277_v51  ;;  %582 = vmatmul.mubr.f32.gmra.mrb[2].mxu1 %v309_v52  ;;  %v2031_v51 = vpack.c.bf16 %v766_v44, %v764_v43  ;;  %v2033_v52 = vpack.c.bf16 %v771_v46, %v769_v45  ;;  %v301_v43 = vld [vmem:[%s2679_s12 + $0xd0] sm:$0xff]  ;;  %v304_v45 = vld [vmem:[%s2679_s12 + $0xe8] sm:$0xff] }
  0xb4   : > { %491 = vmatprep.mubr.f32.mxu0 %v280_v53  ;;  %587 = vmatprep.mubr.f32.mxu1 %v312_v54  ;;  %v768_v53 = vld [vmem:[#allocation7 + $0x100] sm:$0xff]  ;;  %v770_v54 = vld [vmem:[#allocation7 + $0x110] sm:$0xff]  ;;  %v336_v46 = vld [vmem:[%s2679_s12 + $0x1e8] sm:$0xff] }
  0xb5   : > { %2008 = vmatpush1.bf16.msra.mxu1 %v2007_v55  ;;  %2072 = vmatpush1.bf16.msra.mxu0 %v2007_v55  ;;  %v773_v55 = vld [vmem:[#allocation7 + $0x128] sm:$0xff]  ;;  %v333_v44 = vld [vmem:[%s2679_s12 + $0x1d0] sm:$0xff] }
  0xb6   : > { %2010 = vmatprep.subr.bf16.mxu1 %v2009_v56  ;;  %2074 = vmatprep.subr.bf16.mxu0 %v2009_v56  ;;  %v775_v56 = vld [vmem:[#allocation7 + $0x138] sm:$0xff] }
  0xb7   : > { %492 = vmatmul.mubr.f32.gmra.mrb[4].mxu0 %v279_v61  ;;  %588 = vmatmul.mubr.f32.gmra.mrb[4].mxu1 %v311_v62  ;;  %v2035_v61 = vpack.c.bf16 %v770_v54, %v768_v53  ;;  %v2037_v62 = vpack.c.bf16 %v775_v56, %v773_v55  ;;  %v306_v53 = vld [vmem:[%s2679_s12 + $0xf8] sm:$0xff]  ;;  %v305_v56 = vld [vmem:[%s2679_s12 + $0xf0] sm:$0xff] }
  0xb8   : > { %497 = vmatprep.mubr.f32.mxu0 %v282_v63  ;;  %593 = vmatprep.mubr.f32.mxu1 %v314_v0  ;;  %v772_v63 = vld [vmem:[#allocation7 + $0x120] sm:$0xff]  ;;  %v774_v0 = vld [vmem:[#allocation7 + $0x130] sm:$0xff]  ;;  %v338_v54 = vld [vmem:[%s2679_s12 + $0x1f8] sm:$0xff] }
  0xb9   : > { %2012 = vmatpush1.bf16.msra.mxu1 %v2011_v1  ;;  %2076 = vmatpush1.bf16.msra.mxu0 %v2011_v1  ;;  %v777_v1 = vld [vmem:[#allocation7 + $0x148] sm:$0xff] }
  0xba   : > { %2014 = vmatprep.subr.bf16.mxu1 %v2013_v2  ;;  %2078 = vmatprep.subr.bf16.mxu0 %v2013_v2  ;;  %v779_v2 = vld [vmem:[#allocation7 + $0x158] sm:$0xff] }
  0xbb   : > { %498 = vmatmul.mubr.f32.gmra.mrb[6].mxu0 %v281_v7  ;;  %594 = vmatmul.mubr.f32.gmra.mrb[6].mxu1 %v313_v8  ;;  %v2039_v7 = vpack.c.bf16 %v774_v0, %v772_v63  ;;  %v2041_v8 = vpack.c.bf16 %v779_v2, %v777_v1  ;;  %v405_v0 = vlaneseq }
  0xbc   : > { %503 = vmatprep.mubr.f32.mxu0 %v284_v9  ;;  %599 = vmatprep.mubr.f32.mxu1 %v316_v10  ;;  %v776_v9 = vld [vmem:[#allocation7 + $0x140] sm:$0xff]  ;;  %v778_v10 = vld [vmem:[#allocation7 + $0x150] sm:$0xff] }
  0xbd   : > { %2016 = vmatpush1.bf16.msra.mxu1 %v2015_v11  ;;  %2080 = vmatpush1.bf16.msra.mxu0 %v2015_v11  ;;  %v781_v11 = vld [vmem:[#allocation7 + $0x168] sm:$0xff]  ;;  %v2753_v1 = vshrl.u32 %v405_v0, 7 }
  0xbe   : > { %2018 = vmatprep.subr.bf16.mxu1 %v2017_v12  ;;  %2082 = vmatprep.subr.bf16.mxu0 %v2017_v12  ;;  %v783_v12 = vld [vmem:[#allocation7 + $0x178] sm:$0xff] }
  0xbf   : > { %504 = vmatmul.mubr.f32.gmra.mrb[8].mxu0 %v283_v17  ;;  %600 = vmatmul.mubr.f32.gmra.mrb[8].mxu1 %v315_v18  ;;  %v2043_v17 = vpack.c.bf16 %v778_v10, %v776_v9  ;;  %v2045_v18 = vpack.c.bf16 %v783_v12, %v781_v11  ;;  %v407_v2 = vsub.s32 0, %v2753_v1 }
  0xc0   : > { %509 = vmatprep.mubr.f32.mxu0 %v286_v19  ;;  %605 = vmatprep.mubr.f32.mxu1 %v318_v20  ;;  %v780_v19 = vld [vmem:[#allocation7 + $0x160] sm:$0xff]  ;;  %v782_v20 = vld [vmem:[#allocation7 + $0x170] sm:$0xff] }
  0xc1   : > { %2020 = vmatpush1.bf16.msra.mxu1 %v2019_v21  ;;  %2084 = vmatpush1.bf16.msra.mxu0 %v2019_v21  ;;  %v785_v21 = vld [vmem:[#allocation7 + $0x188] sm:$0xff] }
  0xc2   : > { %2022 = vmatprep.subr.bf16.mxu1 %v2021_v22  ;;  %2086 = vmatprep.subr.bf16.mxu0 %v2021_v22  ;;  %v787_v22 = vld [vmem:[#allocation7 + $0x198] sm:$0xff] }
  0xc3   : > { %510 = vmatmul.mubr.f32.gmra.mrb[10].mxu0 %v285_v27  ;;  %606 = vmatmul.mubr.f32.gmra.mrb[10].mxu1 %v317_v28  ;;  %v2047_v27 = vpack.c.bf16 %v782_v20, %v780_v19  ;;  %v2049_v28 = vpack.c.bf16 %v787_v22, %v785_v21 }
  0xc4   : > { %515 = vmatprep.mubr.f32.mxu0 %v288_v29  ;;  %611 = vmatprep.mubr.f32.mxu1 %v320_v30  ;;  %v784_v29 = vld [vmem:[#allocation7 + $0x180] sm:$0xff]  ;;  %v786_v30 = vld [vmem:[#allocation7 + $0x190] sm:$0xff] }
  0xc5   : > { %2024 = vmatpush1.bf16.msra.mxu1 %v2023_v31  ;;  %2088 = vmatpush1.bf16.msra.mxu0 %v2023_v31  ;;  %v789_v31 = vld [vmem:[#allocation7 + $0x1a8] sm:$0xff] }
  0xc6   : > { %2026 = vmatprep.subr.bf16.mxu1 %v2025_v32  ;;  %2090 = vmatprep.subr.bf16.mxu0 %v2025_v32  ;;  %v791_v32 = vld [vmem:[#allocation7 + $0x1b8] sm:$0xff] }
  0xc7   : > { %516 = vmatmul.mubr.f32.gmra.mrb[12].mxu0 %v287_v37  ;;  %612 = vmatmul.mubr.f32.gmra.mrb[12].mxu1 %v319_v38  ;;  %v2051_v37 = vpack.c.bf16 %v786_v30, %v784_v29  ;;  %v2053_v38 = vpack.c.bf16 %v791_v32, %v789_v31 }
  0xc8   : > { %521 = vmatprep.mubr.f32.mxu0 %v290_v39  ;;  %617 = vmatprep.mubr.f32.mxu1 %v322_v40  ;;  %v788_v39 = vld [vmem:[#allocation7 + $0x1a0] sm:$0xff]  ;;  %v790_v40 = vld [vmem:[#allocation7 + $0x1b0] sm:$0xff] }
  0xc9   : > { %2028 = vmatpush1.bf16.msra.mxu1 %v2027_v41  ;;  %2092 = vmatpush1.bf16.msra.mxu0 %v2027_v41  ;;  %v793_v41 = vld [vmem:[#allocation7 + $0x1c8] sm:$0xff] }
  0xca   : > { %2030 = vmatprep.subr.bf16.mxu1 %v2029_v42  ;;  %2094 = vmatprep.subr.bf16.mxu0 %v2029_v42  ;;  %v795_v42 = vld [vmem:[#allocation7 + $0x1d8] sm:$0xff] }
  0xcb   : > { %522 = vmatmul.mubr.f32.gmra.mrb[14].mxu0 %v289_v47  ;;  %618 = vmatmul.mubr.f32.gmra.mrb[14].mxu1 %v321_v48  ;;  %v2055_v47 = vpack.c.bf16 %v790_v40, %v788_v39  ;;  %v2057_v48 = vpack.c.bf16 %v795_v42, %v793_v41 }
  0xcc   : > { %527 = vmatprep.mubr.f32.mxu0 %v292_v49  ;;  %623 = vmatprep.mubr.f32.mxu1 %v324_v50  ;;  %v792_v49 = vld [vmem:[#allocation7 + $0x1c0] sm:$0xff]  ;;  %v794_v50 = vld [vmem:[#allocation7 + $0x1d0] sm:$0xff] }
  0xcd   : > { %2032 = vmatpush1.bf16.msra.mxu1 %v2031_v51  ;;  %2096 = vmatpush1.bf16.msra.mxu0 %v2031_v51  ;;  %v303_v51 = vld [vmem:[%s2679_s12 + $0xe0] sm:$0xff]  ;;  %v2059_v55 = vpack.c.bf16 %v794_v50, %v792_v49 }
  0xce   : > { %2034 = vmatprep.subr.bf16.mxu1 %v2033_v52  ;;  %2098 = vmatprep.subr.bf16.mxu0 %v2033_v52  ;;  %v335_v52 = vld [vmem:[%s2679_s12 + $0x1e0] sm:$0xff] }
  0xcf   : > { %528 = vmatmul.mubr.f32.gmra.mrb[16].mxu0 %v291_v57  ;;  %624 = vmatmul.mubr.f32.gmra.mrb[16].mxu1 %v323_v58  ;;  %v337_v57 = vld [vmem:[%s2679_s12 + $0x1f0] sm:$0xff]  ;;  %v797_v58 = vld [vmem:[#allocation7 + $0x1e8] sm:$0xff] }
  0xd0   : > { %533 = vmatprep.mubr.f32.mxu0 %v294_v59  ;;  %629 = vmatprep.mubr.f32.mxu1 %v326_v60  ;;  %v799_v59 = vld [vmem:[#allocation7 + $0x1f8] sm:$0xff] }
  0xd1   : > { %2036 = vmatpush1.bf16.msra.mxu1 %v2035_v61  ;;  %2100 = vmatpush1.bf16.msra.mxu0 %v2035_v61  ;;  %v2061_v60 = vpack.c.bf16 %v799_v59, %v797_v58  ;;  %v796_v61 = vld [vmem:[#allocation7 + $0x1e0] sm:$0xff] }
  0xd2   : > { %2038 = vmatprep.subr.bf16.mxu1 %v2037_v62  ;;  %2102 = vmatprep.subr.bf16.mxu0 %v2037_v62  ;;  %v798_v62 = vld [vmem:[#allocation7 + $0x1f0] sm:$0xff] }
  0xd3   : > { %534 = vmatmul.mubr.f32.gmra.mrb[18].mxu0 %v293_v3  ;;  %630 = vmatmul.mubr.f32.gmra.mrb[18].mxu1 %v325_v4  ;;  %v2063_v63 = vpack.c.bf16 %v798_v62, %v796_v61  ;;  %v403_v3 = vld [vmem:[%s3508_s2] sm:$0x3]  ;;  %v411_v4 = vsub.s32 1, %v2753_v1 }
  0xd4   : > { %539 = vmatprep.mubr.f32.mxu0 %v296_v5  ;;  %635 = vmatprep.mubr.f32.mxu1 %v328_v6  ;;  %v2762_v5 = vrot.slane %v403_v3, %v407_v2 }
  0xd5   : > { %2040 = vmatpush1.bf16.msra.mxu1 %v2039_v7  ;;  %2104 = vmatpush1.bf16.msra.mxu0 %v2039_v7  ;;  %v2766_v6 = vrot.slane %v403_v3, %v411_v4 }
  0xd6   : > { %2042 = vmatprep.subr.bf16.mxu1 %v2041_v8  ;;  %2106 = vmatprep.subr.bf16.mxu0 %v2041_v8 }
  0xd7   : > { %540 = vmatmul.mubr.f32.gmra.mrb[20].mxu0 %v295_v13  ;;  %636 = vmatmul.mubr.f32.gmra.mrb[20].mxu1 %v327_v14 }
  0xd8   : > { %545 = vmatprep.mubr.f32.mxu0 %v298_v15  ;;  %641 = vmatprep.mubr.f32.mxu1 %v330_v16 }
  0xd9   : > { %2044 = vmatpush1.bf16.msra.mxu1 %v2043_v17  ;;  %2108 = vmatpush1.bf16.msra.mxu0 %v2043_v17 }
  0xda   : > { %2046 = vmatprep.subr.bf16.mxu1 %v2045_v18  ;;  %2110 = vmatprep.subr.bf16.mxu0 %v2045_v18 }
  0xdb   : > { %546 = vmatmul.mubr.f32.gmra.mrb[22].mxu0 %v297_v23  ;;  %642 = vmatmul.mubr.f32.gmra.mrb[22].mxu1 %v329_v24 }
  0xdc   : > { %551 = vmatprep.mubr.f32.mxu0 %v300_v25  ;;  %647 = vmatprep.mubr.f32.mxu1 %v332_v26 }
  0xdd   : > { %2048 = vmatpush1.bf16.msra.mxu1 %v2047_v27  ;;  %2112 = vmatpush1.bf16.msra.mxu0 %v2047_v27 }
  0xde   : > { %2050 = vmatprep.subr.bf16.mxu1 %v2049_v28  ;;  %2114 = vmatprep.subr.bf16.mxu0 %v2049_v28 }
  0xdf   : > { %552 = vmatmul.mubr.f32.gmra.mrb[24].mxu0 %v299_v33  ;;  %648 = vmatmul.mubr.f32.gmra.mrb[24].mxu1 %v331_v34 }
  0xe0   : > { %557 = vmatprep.mubr.f32.mxu0 %v302_v35  ;;  %653 = vmatprep.mubr.f32.mxu1 %v334_v36 }
  0xe1   : > { %2052 = vmatpush1.bf16.msra.mxu1 %v2051_v37  ;;  %2116 = vmatpush1.bf16.msra.mxu0 %v2051_v37 }
  0xe2   : > { %2054 = vmatprep.subr.bf16.mxu1 %v2053_v38  ;;  %2118 = vmatprep.subr.bf16.mxu0 %v2053_v38 }
  0xe3   : > { %558 = vmatmul.mubr.f32.gmra.mrb[26].mxu0 %v301_v43  ;;  %654 = vmatmul.mubr.f32.gmra.mrb[26].mxu1 %v333_v44 }
  0xe4   : > { %563 = vmatprep.mubr.f32.mxu0 %v304_v45  ;;  %659 = vmatprep.mubr.f32.mxu1 %v336_v46 }
  0xe5   : > { %2056 = vmatpush1.bf16.msra.mxu1 %v2055_v47  ;;  %2120 = vmatpush1.bf16.msra.mxu0 %v2055_v47 }
  0xe6   : > { %2058 = vmatprep.subr.bf16.mxu1 %v2057_v48  ;;  %2122 = vmatprep.subr.bf16.mxu0 %v2057_v48 }
  0xe7   : > { %564 = vmatmul.mubr.f32.gmra.mrb[28].mxu0 %v303_v51  ;;  %660 = vmatmul.mubr.f32.gmra.mrb[28].mxu1 %v335_v52 }
  0xe8   : > { %569 = vmatprep.mubr.f32.mxu0 %v306_v53  ;;  %665 = vmatprep.mubr.f32.mxu1 %v338_v54 }
  0xe9   : > { %2060 = vmatpush1.bf16.msra.mxu1 %v2059_v55  ;;  %2124 = vmatpush1.bf16.msra.mxu0 %v2059_v55 }
  0xea   : > { %2062 = vmatprep.subr.bf16.mxu1 %v2061_v60  ;;  %2126 = vmatprep.subr.bf16.mxu0 %v2061_v60 }
  0xeb   : > { %570 = vmatmul.mubr.f32.gmra.mrb[30].mxu0 %v305_v56  ;;  %666 = vmatmul.mubr.f32.gmra.mrb[30].mxu1 %v337_v57 }
  0xed   : > { %2064 = vmatpush1.bf16.msra.mxu1 %v2063_v63  ;;  %2128 = vmatpush1.bf16.msra.mxu0 %v2063_v63 }
 0x182   : > { %v481_v7 = vpop.f32.mrb[0].mxu0  ;;  %v577_v8 = vpop.f32.mrb[0].mxu1 }
 0x183   : > { %v482_v9 = vadd.f32 %v481_v7, %v2762_v5  ;;  %v483_v10 = vpop.f32.mrb[1].mxu0  ;;  %v2770_v11 = vadd.f32 %v577_v8, %v2762_v5  ;;  %v2772_v12 = vpop.f32.mrb[1].mxu1 }
 0x184   : > { %v484_v13 = vadd.f32 %v483_v10, %v2766_v6 }
 0x185   : > { %v672_v17 = vmax.f32 %v482_v9, 0.0 }
 0x186   : > { %v673_v14 = vmax.f32 %v484_v13, 0.0  ;;  %v487_v15 = vpop.f32.mrb[2].mxu0  ;;  %v583_v16 = vpop.f32.mrb[2].mxu1 }
 0x187   : > { %v488_v18 = vadd.f32 %v487_v15, %v2762_v5  ;;  %v489_v19 = vpop.f32.mrb[3].mxu0  ;;  %v2777_v20 = vadd.f32 %v583_v16, %v2762_v5  ;;  %v585_v21 = vpop.f32.mrb[3].mxu1 }
 0x188   : > { %v490_v22 = vadd.f32 %v489_v19, %v2766_v6  ;;  %876 = vmatprep.mubr.f32.mxu1 %v673_v14  ;;  %v2781_v23 = vadd.f32 %v585_v21, %v2766_v6 }
 0x189   : > { %877 = vmatmul.mubr.f32.vlgmr.msra.gmra.mrb[32].mxu1 %v672_v17  ;;  %v674_v27 = vmax.f32 %v488_v18, 0.0 }
 0x18a   : > { %v675_v24 = vmax.f32 %v490_v22, 0.0  ;;  %v493_v25 = vpop.f32.mrb[4].mxu0  ;;  %v589_v26 = vpop.f32.mrb[4].mxu1 }
 0x18b   : > { %v494_v28 = vadd.f32 %v493_v25, %v2762_v5  ;;  %v495_v29 = vpop.f32.mrb[5].mxu0  ;;  %v2785_v30 = vadd.f32 %v589_v26, %v2762_v5  ;;  %v591_v31 = vpop.f32.mrb[5].mxu1 }
 0x18c   : > { %v496_v32 = vadd.f32 %v495_v29, %v2766_v6  ;;  %882 = vmatprep.mubr.f32.mxu1 %v675_v24  ;;  %v2789_v33 = vadd.f32 %v591_v31, %v2766_v6 }
 0x18d   : > { %883 = vmatmul.mubr.f32.gmra.mrb[34].mxu1 %v674_v27  ;;  %v676_v37 = vmax.f32 %v494_v28, 0.0 }
 0x18e   : > { %v677_v34 = vmax.f32 %v496_v32, 0.0  ;;  %v499_v35 = vpop.f32.mrb[6].mxu0  ;;  %v595_v36 = vpop.f32.mrb[6].mxu1 }
 0x18f   : > { %v500_v38 = vadd.f32 %v499_v35, %v2762_v5  ;;  %v501_v39 = vpop.f32.mrb[7].mxu0  ;;  %v2793_v40 = vadd.f32 %v595_v36, %v2762_v5  ;;  %v597_v41 = vpop.f32.mrb[7].mxu1 }
 0x190   : > { %v502_v42 = vadd.f32 %v501_v39, %v2766_v6  ;;  %888 = vmatprep.mubr.f32.mxu1 %v677_v34  ;;  %v2797_v43 = vadd.f32 %v597_v41, %v2766_v6 }
 0x191   : > { %889 = vmatmul.mubr.f32.gmra.mrb[36].mxu1 %v676_v37  ;;  %v678_v47 = vmax.f32 %v500_v38, 0.0 }
 0x192   : > { %v679_v44 = vmax.f32 %v502_v42, 0.0  ;;  %v505_v45 = vpop.f32.mrb[8].mxu0  ;;  %v601_v46 = vpop.f32.mrb[8].mxu1 }
 0x193   : > { %v506_v48 = vadd.f32 %v505_v45, %v2762_v5  ;;  %v507_v49 = vpop.f32.mrb[9].mxu0  ;;  %v2801_v50 = vadd.f32 %v601_v46, %v2762_v5  ;;  %v603_v51 = vpop.f32.mrb[9].mxu1 }
 0x194   : > { %v508_v52 = vadd.f32 %v507_v49, %v2766_v6  ;;  %894 = vmatprep.mubr.f32.mxu1 %v679_v44  ;;  %v2805_v53 = vadd.f32 %v603_v51, %v2766_v6 }
 0x195   : > { %895 = vmatmul.mubr.f32.gmra.mrb[38].mxu1 %v678_v47  ;;  %v680_v57 = vmax.f32 %v506_v48, 0.0 }
 0x196   : > { %v681_v54 = vmax.f32 %v508_v52, 0.0  ;;  %v511_v55 = vpop.f32.mrb[10].mxu0  ;;  %v607_v56 = vpop.f32.mrb[10].mxu1 }
 0x197   : > { %v512_v58 = vadd.f32 %v511_v55, %v2762_v5  ;;  %v513_v59 = vpop.f32.mrb[11].mxu0  ;;  %v2809_v60 = vadd.f32 %v607_v56, %v2762_v5  ;;  %v609_v61 = vpop.f32.mrb[11].mxu1 }
 0x198   : > { %v514_v62 = vadd.f32 %v513_v59, %v2766_v6  ;;  %900 = vmatprep.mubr.f32.mxu1 %v681_v54  ;;  %v2813_v63 = vadd.f32 %v609_v61, %v2766_v6 }
 0x199   : > { %901 = vmatmul.mubr.f32.gmra.mrb[40].mxu1 %v680_v57  ;;  %v682_v8 = vmax.f32 %v512_v58, 0.0 }
 0x19a   : > { %v683_v0 = vmax.f32 %v514_v62, 0.0  ;;  %v517_v3 = vpop.f32.mrb[12].mxu0  ;;  %v613_v7 = vpop.f32.mrb[12].mxu1 }
 0x19b   : > { %v518_v9 = vadd.f32 %v517_v3, %v2762_v5  ;;  %v519_v10 = vpop.f32.mrb[13].mxu0  ;;  %v2817_v13 = vadd.f32 %v613_v7, %v2762_v5  ;;  %v615_v14 = vpop.f32.mrb[13].mxu1 }
 0x19c   : > { %v520_v15 = vadd.f32 %v519_v10, %v2766_v6  ;;  %906 = vmatprep.mubr.f32.mxu1 %v683_v0  ;;  %v2821_v16 = vadd.f32 %v615_v14, %v2766_v6 }
 0x19d   : > { %907 = vmatmul.mubr.f32.gmra.mrb[42].mxu1 %v682_v8  ;;  %v684_v21 = vmax.f32 %v518_v9, 0.0 }
 0x19e   : > { %v685_v17 = vmax.f32 %v520_v15, 0.0  ;;  %v523_v18 = vpop.f32.mrb[14].mxu0  ;;  %v619_v19 = vpop.f32.mrb[14].mxu1 }
 0x19f   : > { %v524_v22 = vadd.f32 %v523_v18, %v2762_v5  ;;  %v525_v24 = vpop.f32.mrb[15].mxu0  ;;  %v2825_v25 = vadd.f32 %v619_v19, %v2762_v5  ;;  %v621_v26 = vpop.f32.mrb[15].mxu1 }
 0x1a0   : > { %v526_v27 = vadd.f32 %v525_v24, %v2766_v6  ;;  %912 = vmatprep.mubr.f32.mxu1 %v685_v17  ;;  %v2829_v28 = vadd.f32 %v621_v26, %v2766_v6 }
 0x1a1   : > { %913 = vmatmul.mubr.f32.gmra.mrb[44].mxu1 %v684_v21  ;;  %v686_v34 = vmax.f32 %v524_v22, 0.0 }
 0x1a2   : > { %v687_v29 = vmax.f32 %v526_v27, 0.0  ;;  %v529_v31 = vpop.f32.mrb[16].mxu0  ;;  %v625_v32 = vpop.f32.mrb[16].mxu1 }
 0x1a3   : > { %v530_v35 = vadd.f32 %v529_v31, %v2762_v5  ;;  %v531_v36 = vpop.f32.mrb[17].mxu0  ;;  %v2833_v37 = vadd.f32 %v625_v32, %v2762_v5  ;;  %v627_v38 = vpop.f32.mrb[17].mxu1 }
 0x1a4   : > { %v532_v39 = vadd.f32 %v531_v36, %v2766_v6  ;;  %918 = vmatprep.mubr.f32.mxu1 %v687_v29  ;;  %v2837_v41 = vadd.f32 %v627_v38, %v2766_v6 }
 0x1a5   : > { %919 = vmatmul.mubr.f32.gmra.mrb[46].mxu1 %v686_v34  ;;  %v688_v46 = vmax.f32 %v530_v35, 0.0 }
 0x1a6   : > { %v689_v42 = vmax.f32 %v532_v39, 0.0  ;;  %v535_v44 = vpop.f32.mrb[18].mxu0  ;;  %v631_v45 = vpop.f32.mrb[18].mxu1 }
 0x1a7   : > { %v536_v47 = vadd.f32 %v535_v44, %v2762_v5  ;;  %v537_v48 = vpop.f32.mrb[19].mxu0  ;;  %v2841_v49 = vadd.f32 %v631_v45, %v2762_v5  ;;  %v633_v51 = vpop.f32.mrb[19].mxu1 }
 0x1a8   : > { %v538_v52 = vadd.f32 %v537_v48, %v2766_v6  ;;  %924 = vmatprep.mubr.f32.mxu1 %v689_v42  ;;  %v2845_v54 = vadd.f32 %v633_v51, %v2766_v6 }
 0x1a9   : > { %925 = vmatmul.mubr.f32.gmra.mrb[48].mxu1 %v688_v46  ;;  %v690_v58 = vmax.f32 %v536_v47, 0.0 }
 0x1aa   : > { %v691_v55 = vmax.f32 %v538_v52, 0.0  ;;  %v541_v56 = vpop.f32.mrb[20].mxu0  ;;  %v637_v57 = vpop.f32.mrb[20].mxu1 }
 0x1ab   : > { %v542_v59 = vadd.f32 %v541_v56, %v2762_v5  ;;  %v543_v61 = vpop.f32.mrb[21].mxu0  ;;  %v2849_v62 = vadd.f32 %v637_v57, %v2762_v5  ;;  %v639_v0 = vpop.f32.mrb[21].mxu1 }
 0x1ac   : > { %v544_v3 = vadd.f32 %v543_v61, %v2766_v6  ;;  %930 = vmatprep.mubr.f32.mxu1 %v691_v55  ;;  %v2853_v7 = vadd.f32 %v639_v0, %v2766_v6 }
 0x1ad   : > { %931 = vmatmul.mubr.f32.gmra.mrb[50].mxu1 %v690_v58  ;;  %v692_v14 = vmax.f32 %v542_v59, 0.0 }
 0x1ae   : > { %v693_v8 = vmax.f32 %v544_v3, 0.0  ;;  %v547_v9 = vpop.f32.mrb[22].mxu0  ;;  %v643_v10 = vpop.f32.mrb[22].mxu1 }
 0x1af   : > { %v548_v15 = vadd.f32 %v547_v9, %v2762_v5  ;;  %v549_v17 = vpop.f32.mrb[23].mxu0  ;;  %v2857_v18 = vadd.f32 %v643_v10, %v2762_v5  ;;  %v645_v19 = vpop.f32.mrb[23].mxu1 }
 0x1b0   : > { %v550_v21 = vadd.f32 %v549_v17, %v2766_v6  ;;  %936 = vmatprep.mubr.f32.mxu1 %v693_v8  ;;  %v2861_v22 = vadd.f32 %v645_v19, %v2766_v6  ;;  %v580_v17 = vadd.f32 %v2772_v12, %v2766_v6  ;;  %v707_v12 = vmax.f32 %v2781_v23, 0.0 }
 0x1b1   : > { %937 = vmatmul.mubr.f32.gmra.mrb[52].mxu1 %v692_v14  ;;  %v694_v29 = vmax.f32 %v548_v15, 0.0  ;;  %v710_v23 = vmax.f32 %v2793_v40, 0.0  ;;  %v721_v40 = vmax.f32 %v2837_v41, 0.0  ;;  %v724_v41 = vmax.f32 %v2849_v62, 0.0 }
 0x1b2   : > { %v695_v24 = vmax.f32 %v550_v21, 0.0  ;;  %v553_v26 = vpop.f32.mrb[24].mxu0  ;;  %v649_v27 = vpop.f32.mrb[24].mxu1 }
 0x1b3   : > { %v554_v31 = vadd.f32 %v553_v26, %v2762_v5  ;;  %v555_v32 = vpop.f32.mrb[25].mxu0  ;;  %v2865_v34 = vadd.f32 %v649_v27, %v2762_v5  ;;  %v651_v35 = vpop.f32.mrb[25].mxu1 }
 0x1b4   : > { %v556_v36 = vadd.f32 %v555_v32, %v2766_v6  ;;  %942 = vmatprep.mubr.f32.mxu1 %v695_v24  ;;  %v2869_v38 = vadd.f32 %v651_v35, %v2766_v6 }
 0x1b5   : > { %943 = vmatmul.mubr.f32.gmra.mrb[54].mxu1 %v694_v29  ;;  %v696_v45 = vmax.f32 %v554_v31, 0.0 }
 0x1b6   : > { %v697_v39 = vmax.f32 %v556_v36, 0.0  ;;  %v559_v42 = vpop.f32.mrb[26].mxu0  ;;  %v655_v44 = vpop.f32.mrb[26].mxu1  ;;  %v705_v36 = vmax.f32 %v580_v17, 0.0 }
 0x1b7   : > { %v560_v46 = vadd.f32 %v559_v42, %v2762_v5  ;;  %v561_v47 = vpop.f32.mrb[27].mxu0  ;;  %v2873_v48 = vadd.f32 %v655_v44, %v2762_v5  ;;  %v657_v51 = vpop.f32.mrb[27].mxu1  ;;  %v704_v42 = vmax.f32 %v2770_v11, 0.0  ;;  %v706_v44 = vmax.f32 %v2777_v20, 0.0 }
 0x1b8   : > { %v562_v52 = vadd.f32 %v561_v47, %v2766_v6  ;;  %948 = vmatprep.mubr.f32.mxu1 %v697_v39  ;;  %v2877_v55 = vadd.f32 %v657_v51, %v2766_v6  ;;  %v715_v11 = vmax.f32 %v2813_v63, 0.0  ;;  %v717_v20 = vmax.f32 %v2821_v16, 0.0 }
 0x1b9   : > { %949 = vmatmul.mubr.f32.gmra.mrb[56].mxu1 %v696_v45  ;;  %v698_v59 = vmax.f32 %v560_v46, 0.0  ;;  %v708_v45 = vmax.f32 %v2785_v30, 0.0  ;;  %v713_v46 = vmax.f32 %v2805_v53, 0.0  ;;  %v719_v30 = vmax.f32 %v2829_v28, 0.0 }
 0x1ba   : > { %v699_v56 = vmax.f32 %v562_v52, 0.0  ;;  %v565_v57 = vpop.f32.mrb[28].mxu0  ;;  %v661_v58 = vpop.f32.mrb[28].mxu1  ;;  %v716_v53 = vmax.f32 %v2817_v13, 0.0  ;;  %v718_v63 = vmax.f32 %v2825_v25, 0.0  ;;  %v720_v16 = vmax.f32 %v2833_v37, 0.0 }
 0x1bb   : > { %v566_v61 = vadd.f32 %v565_v57, %v2762_v5  ;;  %v567_v0 = vpop.f32.mrb[29].mxu0  ;;  %v2881_v3 = vadd.f32 %v661_v58, %v2762_v5  ;;  %v663_v8 = vpop.f32.mrb[29].mxu1  ;;  %v722_v28 = vmax.f32 %v2841_v49, 0.0  ;;  %v727_v13 = vmax.f32 %v2861_v22, 0.0 }
 0x1bc   : > { %v568_v9 = vadd.f32 %v567_v0, %v2766_v6  ;;  %954 = vmatprep.mubr.f32.mxu1 %v699_v56  ;;  %v2885_v10 = vadd.f32 %v663_v8, %v2766_v6  ;;  %v729_v25 = vmax.f32 %v2869_v38, 0.0  ;;  %v731_v37 = vmax.f32 %v2877_v55, 0.0 }
 0x1bd   : > { %955 = vmatmul.mubr.f32.gmra.mrb[58].mxu1 %v698_v59  ;;  %v700_v21 = vmax.f32 %v566_v61, 0.0  ;;  %v730_v22 = vmax.f32 %v2873_v48, 0.0  ;;  %v732_v38 = vmax.f32 %v2881_v3, 0.0 }
 0x1be   : > { %v701_v14 = vmax.f32 %v568_v9, 0.0  ;;  %v571_v15 = vpop.f32.mrb[30].mxu0  ;;  %v667_v19 = vpop.f32.mrb[30].mxu1  ;;  %v733_v49 = vmax.f32 %v2885_v10, 0.0 }
 0x1bf   : > { %v572_v24 = vadd.f32 %v571_v15, %v2762_v5  ;;  %v573_v26 = vpop.f32.mrb[31].mxu0  ;;  %v2891_v27 = vadd.f32 %v667_v19, %v2762_v5  ;;  %v669_v29 = vpop.f32.mrb[31].mxu1  ;;  %v709_v5 = vmax.f32 %v2789_v33, 0.0  ;;  %v712_v33 = vmax.f32 %v2801_v50, 0.0 }
 0x1c0   : > { %v574_v31 = vadd.f32 %v573_v26, %v2766_v6  ;;  %960 = vmatprep.mubr.f32.mxu1 %v701_v14  ;;  %v2895_v32 = vadd.f32 %v669_v29, %v2766_v6  ;;  %v711_v6 = vmax.f32 %v2797_v43, 0.0  ;;  %v714_v43 = vmax.f32 %v2809_v60, 0.0 }
 0x1c1   : > { %961 = vmatmul.mubr.f32.gmra.mrb[60].mxu1 %v700_v21  ;;  %v702_v39 = vmax.f32 %v572_v24, 0.0  ;;  %v723_v50 = vmax.f32 %v2845_v54, 0.0  ;;  %v725_v60 = vmax.f32 %v2853_v7, 0.0  ;;  %v726_v54 = vmax.f32 %v2857_v18, 0.0 }
 0x1c2   : > { %v703_v35 = vmax.f32 %v574_v31, 0.0  ;;  %v728_v7 = vmax.f32 %v2865_v34, 0.0  ;;  %v735_v62 = vmax.f32 %v2895_v32, 0.0  ;;  %v734_v18 = vmax.f32 %v2891_v27, 0.0  ;;  %v800_v34 = vld [vmem:[%s3510_s4] sm:$0x3] }
 0x1c3   : > { %v2933_v47 = vrot.slane %v800_v34, %v407_v2  ;;  %v2937_v48 = vrot.slane %v800_v34, %v411_v4 }
 0x1c4   : > { %966 = vmatprep.mubr.f32.mxu1 %v703_v35 }
 0x1c5   : > { %967 = vmatmul.mubr.f32.gmra.mrb[62].mxu1 %v702_v39 }
 0x1c6   : > { %972 = vmatprep.mubr.f32.mxu1 %v705_v36 }
 0x1c9   : > { %973 = vmatmul.mubr.f32.gmra.mrb[64].mxu1 %v704_v42 }
 0x1ca   : > { %978 = vmatprep.mubr.f32.mxu1 %v707_v12 }
 0x1cd   : > { %979 = vmatmul.mubr.f32.gmra.mrb[66].mxu1 %v706_v44 }
 0x1ce   : > { %984 = vmatprep.mubr.f32.mxu1 %v709_v5 }
 0x1d1   : > { %985 = vmatmul.mubr.f32.gmra.mrb[68].mxu1 %v708_v45 }
 0x1d2   : > { %990 = vmatprep.mubr.f32.mxu1 %v711_v6 }
 0x1d5   : > { %991 = vmatmul.mubr.f32.gmra.mrb[70].mxu1 %v710_v23 }
 0x1d6   : > { %996 = vmatprep.mubr.f32.mxu1 %v713_v46 }
 0x1d9   : > { %997 = vmatmul.mubr.f32.gmra.mrb[72].mxu1 %v712_v33 }
 0x1da   : > { %1002 = vmatprep.mubr.f32.mxu1 %v715_v11 }
 0x1dd   : > { %1003 = vmatmul.mubr.f32.gmra.mrb[74].mxu1 %v714_v43 }
 0x1de   : > { %1008 = vmatprep.mubr.f32.mxu1 %v717_v20 }
 0x1e1   : > { %1009 = vmatmul.mubr.f32.gmra.mrb[76].mxu1 %v716_v53 }
 0x1e2   : > { %1014 = vmatprep.mubr.f32.mxu1 %v719_v30 }
 0x1e5   : > { %1015 = vmatmul.mubr.f32.gmra.mrb[78].mxu1 %v718_v63 }
 0x1e6   : > { %1020 = vmatprep.mubr.f32.mxu1 %v721_v40 }
 0x1e9   : > { %1021 = vmatmul.mubr.f32.gmra.mrb[80].mxu1 %v720_v16 }
 0x1ea   : > { %1026 = vmatprep.mubr.f32.mxu1 %v723_v50 }
 0x1ed   : > { %1027 = vmatmul.mubr.f32.gmra.mrb[82].mxu1 %v722_v28 }
 0x1ee   : > { %1032 = vmatprep.mubr.f32.mxu1 %v725_v60 }
 0x1f1   : > { %1033 = vmatmul.mubr.f32.gmra.mrb[84].mxu1 %v724_v41 }
 0x1f2   : > { %1038 = vmatprep.mubr.f32.mxu1 %v727_v13 }
 0x1f5   : > { %1039 = vmatmul.mubr.f32.gmra.mrb[86].mxu1 %v726_v54 }
 0x1f6   : > { %1044 = vmatprep.mubr.f32.mxu1 %v729_v25 }
 0x1f9   : > { %1045 = vmatmul.mubr.f32.gmra.mrb[88].mxu1 %v728_v7 }
 0x1fa   : > { %1050 = vmatprep.mubr.f32.mxu1 %v731_v37 }
 0x1fd   : > { %1051 = vmatmul.mubr.f32.gmra.mrb[90].mxu1 %v730_v22 }
 0x1fe   : > { %1056 = vmatprep.mubr.f32.mxu1 %v733_v49 }
 0x201   : > { %1057 = vmatmul.mubr.f32.gmra.mrb[92].mxu1 %v732_v38 }
 0x202   : > { %1062 = vmatprep.mubr.f32.mxu1 %v735_v62 }
 0x205   : > { %1063 = vmatmul.mubr.f32.gmra.mrb[94].mxu1 %v734_v18 }
 0x25c   : > { %v878_v51 = vpop.f32.mrb[32].mxu1 }
 0x25d   : > { %v879_v52 = vadd.f32 %v878_v51, %v2933_v47  ;;  %v880_v55 = vpop.f32.mrb[33].mxu1 }
 0x25e   : > { %v881_v56 = vadd.f32 %v880_v55, %v2937_v48 }
 0x25f   : > { %v1069_v59 = vmax.f32 %v879_v52, 0.0 }
 0x260   : > { %v1070_v57 = vmax.f32 %v881_v56, 0.0  ;;  %v884_v58 = vpop.f32.mrb[34].mxu1 }
 0x261   : > { %v885_v61 = vadd.f32 %v884_v58, %v2933_v47  ;;  %v886_v0 = vpop.f32.mrb[35].mxu1 }
 0x262   : > { %v887_v3 = vadd.f32 %v886_v0, %v2937_v48  ;;  %1197 = vmatprep.mubr.f32.mxu0 %v1070_v57 }
 0x263   : > { %1198 = vmatmul.mubr.f32.vlgmr.msra.gmra.mrb[32].mxu0 %v1069_v59  ;;  %v1071_v4 = vmax.f32 %v885_v61, 0.0 }
 0x264   : > { %v1072_v2 = vmax.f32 %v887_v3, 0.0  ;;  %v890_v1 = vpop.f32.mrb[36].mxu1 }
 0x265   : > { %v891_v8 = vadd.f32 %v890_v1, %v2933_v47  ;;  %v892_v9 = vpop.f32.mrb[37].mxu1 }
 0x266   : > { %v893_v10 = vadd.f32 %v892_v9, %v2937_v48  ;;  %1203 = vmatprep.mubr.f32.mxu0 %v1072_v2 }
 0x267   : > { %1204 = vmatmul.mubr.f32.gmra.mrb[34].mxu0 %v1071_v4  ;;  %v1073_v17 = vmax.f32 %v891_v8, 0.0 }
 0x268   : > { %v1074_v14 = vmax.f32 %v893_v10, 0.0  ;;  %v896_v15 = vpop.f32.mrb[38].mxu1 }
 0x269   : > { %v897_v19 = vadd.f32 %v896_v15, %v2933_v47  ;;  %v898_v21 = vpop.f32.mrb[39].mxu1 }
 0x26a   : > { %v899_v24 = vadd.f32 %v898_v21, %v2937_v48  ;;  %1209 = vmatprep.mubr.f32.mxu0 %v1074_v14 }
 0x26b   : > { %1210 = vmatmul.mubr.f32.gmra.mrb[36].mxu0 %v1073_v17  ;;  %v1075_v29 = vmax.f32 %v897_v19, 0.0 }
 0x26c   : > { %v1076_v26 = vmax.f32 %v899_v24, 0.0  ;;  %v902_v27 = vpop.f32.mrb[40].mxu1 }
 0x26d   : > { %v903_v31 = vadd.f32 %v902_v27, %v2933_v47  ;;  %v904_v32 = vpop.f32.mrb[41].mxu1 }
 0x26e   : > { %v905_v35 = vadd.f32 %v904_v32, %v2937_v48  ;;  %1215 = vmatprep.mubr.f32.mxu0 %v1076_v26 }
 0x26f   : > { %1216 = vmatmul.mubr.f32.gmra.mrb[38].mxu0 %v1075_v29  ;;  %v1077_v12 = vmax.f32 %v903_v31, 0.0 }
 0x270   : > { %v1078_v36 = vmax.f32 %v905_v35, 0.0  ;;  %v908_v39 = vpop.f32.mrb[42].mxu1 }
 0x271   : > { %v909_v42 = vadd.f32 %v908_v39, %v2933_v47  ;;  %v910_v5 = vpop.f32.mrb[43].mxu1 }
 0x272   : > { %v911_v44 = vadd.f32 %v910_v5, %v2937_v48  ;;  %1221 = vmatprep.mubr.f32.mxu0 %v1078_v36 }
 0x273   : > { %1222 = vmatmul.mubr.f32.gmra.mrb[40].mxu0 %v1077_v12  ;;  %v1079_v46 = vmax.f32 %v909_v42, 0.0 }
 0x274   : > { %v1080_v6 = vmax.f32 %v911_v44, 0.0  ;;  %v914_v45 = vpop.f32.mrb[44].mxu1 }
 0x275   : > { %v915_v23 = vadd.f32 %v914_v45, %v2933_v47  ;;  %v916_v11 = vpop.f32.mrb[45].mxu1 }
 0x276   : > { %v917_v33 = vadd.f32 %v916_v11, %v2937_v48  ;;  %1227 = vmatprep.mubr.f32.mxu0 %v1080_v6 }
 0x277   : > { %1228 = vmatmul.mubr.f32.gmra.mrb[42].mxu0 %v1079_v46  ;;  %v1081_v30 = vmax.f32 %v915_v23, 0.0 }
 0x278   : > { %v1082_v20 = vmax.f32 %v917_v33, 0.0  ;;  %v920_v43 = vpop.f32.mrb[46].mxu1 }
 0x279   : > { %v921_v53 = vadd.f32 %v920_v43, %v2933_v47  ;;  %v922_v40 = vpop.f32.mrb[47].mxu1 }
 0x27a   : > { %v923_v63 = vadd.f32 %v922_v40, %v2937_v48  ;;  %1233 = vmatprep.mubr.f32.mxu0 %v1082_v20 }
 0x27b   : > { %1234 = vmatmul.mubr.f32.gmra.mrb[44].mxu0 %v1081_v30  ;;  %v1083_v60 = vmax.f32 %v921_v53, 0.0 }
 0x27c   : > { %v1084_v50 = vmax.f32 %v923_v63, 0.0  ;;  %v926_v16 = vpop.f32.mrb[48].mxu1 }
 0x27d   : > { %v927_v28 = vadd.f32 %v926_v16, %v2933_v47  ;;  %v928_v13 = vpop.f32.mrb[49].mxu1 }
 0x27e   : > { %v929_v41 = vadd.f32 %v928_v13, %v2937_v48  ;;  %1239 = vmatprep.mubr.f32.mxu0 %v1084_v50 }
 0x27f   : > { %1240 = vmatmul.mubr.f32.gmra.mrb[46].mxu0 %v1083_v60  ;;  %v1085_v37 = vmax.f32 %v927_v28, 0.0 }
 0x280   : > { %v1086_v25 = vmax.f32 %v929_v41, 0.0  ;;  %v932_v54 = vpop.f32.mrb[50].mxu1 }
 0x281   : > { %v933_v7 = vadd.f32 %v932_v54, %v2933_v47  ;;  %v934_v49 = vpop.f32.mrb[51].mxu1 }
 0x282   : > { %v935_v22 = vadd.f32 %v934_v49, %v2937_v48  ;;  %1245 = vmatprep.mubr.f32.mxu0 %v1086_v25 }
 0x283   : > { %1246 = vmatmul.mubr.f32.gmra.mrb[48].mxu0 %v1085_v37  ;;  %v1087_v18 = vmax.f32 %v933_v7, 0.0 }
 0x284   : > { %v1088_v62 = vmax.f32 %v935_v22, 0.0  ;;  %v938_v38 = vpop.f32.mrb[52].mxu1 }
 0x285   : > { %v939_v34 = vadd.f32 %v938_v38, %v2933_v47  ;;  %v940_v51 = vpop.f32.mrb[53].mxu1 }
 0x286   : > { %v941_v52 = vadd.f32 %v940_v51, %v2937_v48  ;;  %1251 = vmatprep.mubr.f32.mxu0 %v1088_v62 }
 0x287   : > { %1252 = vmatmul.mubr.f32.gmra.mrb[50].mxu0 %v1087_v18  ;;  %v1089_v57 = vmax.f32 %v939_v34, 0.0 }
 0x288   : > { %v1090_v55 = vmax.f32 %v941_v52, 0.0  ;;  %v944_v56 = vpop.f32.mrb[54].mxu1 }
 0x289   : > { %v945_v58 = vadd.f32 %v944_v56, %v2933_v47  ;;  %v946_v59 = vpop.f32.mrb[55].mxu1 }
 0x28a   : > { %v947_v61 = vadd.f32 %v946_v59, %v2937_v48  ;;  %1257 = vmatprep.mubr.f32.mxu0 %v1090_v55 }
 0x28b   : > { %1258 = vmatmul.mubr.f32.gmra.mrb[52].mxu0 %v1089_v57  ;;  %v1091_v2 = vmax.f32 %v945_v58, 0.0 }
 0x28c   : > { %v1092_v0 = vmax.f32 %v947_v61, 0.0  ;;  %v950_v3 = vpop.f32.mrb[56].mxu1 }
 0x28d   : > { %v951_v1 = vadd.f32 %v950_v3, %v2933_v47  ;;  %v952_v4 = vpop.f32.mrb[57].mxu1 }
 0x28e   : > { %v953_v8 = vadd.f32 %v952_v4, %v2937_v48  ;;  %1263 = vmatprep.mubr.f32.mxu0 %v1092_v0 }
 0x28f   : > { %1264 = vmatmul.mubr.f32.gmra.mrb[54].mxu0 %v1091_v2  ;;  %v1093_v14 = vmax.f32 %v951_v1, 0.0 }
 0x290   : > { %v1094_v9 = vmax.f32 %v953_v8, 0.0  ;;  %v956_v10 = vpop.f32.mrb[58].mxu1 }
 0x291   : > { %v957_v15 = vadd.f32 %v956_v10, %v2933_v47  ;;  %v958_v17 = vpop.f32.mrb[59].mxu1 }
 0x292   : > { %v959_v19 = vadd.f32 %v958_v17, %v2937_v48  ;;  %1269 = vmatprep.mubr.f32.mxu0 %v1094_v9 }
 0x293   : > { %1270 = vmatmul.mubr.f32.gmra.mrb[56].mxu0 %v1093_v14  ;;  %v1095_v26 = vmax.f32 %v957_v15, 0.0 }
 0x294   : > { %v1096_v21 = vmax.f32 %v959_v19, 0.0  ;;  %v962_v24 = vpop.f32.mrb[60].mxu1 }
 0x295   : > { %v963_v27 = vadd.f32 %v962_v24, %v2933_v47  ;;  %v964_v29 = vpop.f32.mrb[61].mxu1 }
 0x296   : > { %v965_v31 = vadd.f32 %v964_v29, %v2937_v48  ;;  %1275 = vmatprep.mubr.f32.mxu0 %v1096_v21 }
 0x297   : > { %1276 = vmatmul.mubr.f32.gmra.mrb[58].mxu0 %v1095_v26  ;;  %v1097_v36 = vmax.f32 %v963_v27, 0.0 }
 0x298   : > { %v1098_v32 = vmax.f32 %v965_v31, 0.0  ;;  %v968_v35 = vpop.f32.mrb[62].mxu1 }
 0x299   : > { %v969_v39 = vadd.f32 %v968_v35, %v2933_v47  ;;  %v970_v12 = vpop.f32.mrb[63].mxu1 }
 0x29a   : > { %v971_v42 = vadd.f32 %v970_v12, %v2937_v48  ;;  %1281 = vmatprep.mubr.f32.mxu0 %v1098_v32 }
 0x29b   : > { %1282 = vmatmul.mubr.f32.gmra.mrb[60].mxu0 %v1097_v36  ;;  %v1099_v6 = vmax.f32 %v969_v39, 0.0 }
 0x29c   : > { %v1100_v5 = vmax.f32 %v971_v42, 0.0  ;;  %v974_v44 = vpop.f32.mrb[64].mxu1 }
 0x29d   : > { %v975_v45 = vadd.f32 %v974_v44, %v2933_v47  ;;  %v976_v46 = vpop.f32.mrb[65].mxu1 }
 0x29e   : > { %v977_v23 = vadd.f32 %v976_v46, %v2937_v48  ;;  %1287 = vmatprep.mubr.f32.mxu0 %v1100_v5 }
 0x29f   : > { %1288 = vmatmul.mubr.f32.gmra.mrb[62].mxu0 %v1099_v6  ;;  %v1101_v20 = vmax.f32 %v975_v45, 0.0 }
 0x2a0   : > { %v1102_v11 = vmax.f32 %v977_v23, 0.0  ;;  %v980_v33 = vpop.f32.mrb[66].mxu1 }
 0x2a1   : > { %v981_v43 = vadd.f32 %v980_v33, %v2933_v47  ;;  %v982_v30 = vpop.f32.mrb[67].mxu1 }
 0x2a2   : > { %v983_v53 = vadd.f32 %v982_v30, %v2937_v48  ;;  %1293 = vmatprep.mubr.f32.mxu0 %v1102_v11 }
 0x2a3   : > { %1294 = vmatmul.mubr.f32.gmra.mrb[64].mxu0 %v1101_v20  ;;  %v1103_v50 = vmax.f32 %v981_v43, 0.0 }
 0x2a4   : > { %v1104_v40 = vmax.f32 %v983_v53, 0.0  ;;  %v986_v63 = vpop.f32.mrb[68].mxu1 }
 0x2a5   : > { %v987_v16 = vadd.f32 %v986_v63, %v2933_v47  ;;  %v988_v60 = vpop.f32.mrb[69].mxu1 }
 0x2a6   : > { %v989_v28 = vadd.f32 %v988_v60, %v2937_v48  ;;  %1299 = vmatprep.mubr.f32.mxu0 %v1104_v40 }
 0x2a7   : > { %1300 = vmatmul.mubr.f32.gmra.mrb[66].mxu0 %v1103_v50  ;;  %v1105_v25 = vmax.f32 %v987_v16, 0.0 }
 0x2a8   : > { %v1106_v13 = vmax.f32 %v989_v28, 0.0  ;;  %v992_v41 = vpop.f32.mrb[70].mxu1 }
 0x2a9   : > { %v993_v54 = vadd.f32 %v992_v41, %v2933_v47  ;;  %v994_v37 = vpop.f32.mrb[71].mxu1 }
 0x2aa   : > { %v995_v7 = vadd.f32 %v994_v37, %v2937_v48  ;;  %1305 = vmatprep.mubr.f32.mxu0 %v1106_v13 }
 0x2ab   : > { %1306 = vmatmul.mubr.f32.gmra.mrb[68].mxu0 %v1105_v25  ;;  %v1107_v62 = vmax.f32 %v993_v54, 0.0 }
 0x2ac   : > { %v1108_v49 = vmax.f32 %v995_v7, 0.0  ;;  %v998_v22 = vpop.f32.mrb[72].mxu1 }
 0x2ad   : > { %v999_v38 = vadd.f32 %v998_v22, %v2933_v47  ;;  %v1000_v18 = vpop.f32.mrb[73].mxu1 }
 0x2ae   : > { %v1001_v34 = vadd.f32 %v1000_v18, %v2937_v48  ;;  %1311 = vmatprep.mubr.f32.mxu0 %v1108_v49 }
 0x2af   : > { %1312 = vmatmul.mubr.f32.gmra.mrb[70].mxu0 %v1107_v62  ;;  %v1109_v55 = vmax.f32 %v999_v38, 0.0 }
 0x2b0   : > { %v1110_v51 = vmax.f32 %v1001_v34, 0.0  ;;  %v1004_v52 = vpop.f32.mrb[74].mxu1 }
 0x2b1   : > { %v1005_v56 = vadd.f32 %v1004_v52, %v2933_v47  ;;  %v1006_v57 = vpop.f32.mrb[75].mxu1 }
 0x2b2   : > { %v1007_v58 = vadd.f32 %v1006_v57, %v2937_v48  ;;  %1317 = vmatprep.mubr.f32.mxu0 %v1110_v51 }
 0x2b3   : > { %1318 = vmatmul.mubr.f32.gmra.mrb[72].mxu0 %v1109_v55  ;;  %v1111_v0 = vmax.f32 %v1005_v56, 0.0 }
 0x2b4   : > { %v1112_v59 = vmax.f32 %v1007_v58, 0.0  ;;  %v1010_v61 = vpop.f32.mrb[76].mxu1 }
 0x2b5   : > { %v1011_v3 = vadd.f32 %v1010_v61, %v2933_v47  ;;  %v1012_v2 = vpop.f32.mrb[77].mxu1 }
 0x2b6   : > { %v1013_v1 = vadd.f32 %v1012_v2, %v2937_v48  ;;  %1323 = vmatprep.mubr.f32.mxu0 %v1112_v59 }
 0x2b7   : > { %1324 = vmatmul.mubr.f32.gmra.mrb[74].mxu0 %v1111_v0  ;;  %v1113_v9 = vmax.f32 %v1011_v3, 0.0 }
 0x2b8   : > { %v1114_v4 = vmax.f32 %v1013_v1, 0.0  ;;  %v1016_v8 = vpop.f32.mrb[78].mxu1 }
 0x2b9   : > { %v1017_v10 = vadd.f32 %v1016_v8, %v2933_v47  ;;  %v1018_v14 = vpop.f32.mrb[79].mxu1 }
 0x2ba   : > { %v1019_v15 = vadd.f32 %v1018_v14, %v2937_v48  ;;  %1329 = vmatprep.mubr.f32.mxu0 %v1114_v4 }
 0x2bb   : > { %1330 = vmatmul.mubr.f32.gmra.mrb[76].mxu0 %v1113_v9  ;;  %v1115_v21 = vmax.f32 %v1017_v10, 0.0 }
 0x2bc   : > { %v1116_v17 = vmax.f32 %v1019_v15, 0.0  ;;  %v1022_v19 = vpop.f32.mrb[80].mxu1 }
 0x2bd   : > { %v1023_v24 = vadd.f32 %v1022_v19, %v2933_v47  ;;  %v1024_v26 = vpop.f32.mrb[81].mxu1 }
 0x2be   : > { %v1025_v27 = vadd.f32 %v1024_v26, %v2937_v48  ;;  %1335 = vmatprep.mubr.f32.mxu0 %v1116_v17 }
 0x2bf   : > { %1336 = vmatmul.mubr.f32.gmra.mrb[78].mxu0 %v1115_v21  ;;  %v1117_v32 = vmax.f32 %v1023_v24, 0.0 }
 0x2c0   : > { %v1118_v29 = vmax.f32 %v1025_v27, 0.0  ;;  %v1028_v31 = vpop.f32.mrb[82].mxu1 }
 0x2c1   : > { %v1029_v35 = vadd.f32 %v1028_v31, %v2933_v47  ;;  %v1030_v36 = vpop.f32.mrb[83].mxu1 }
 0x2c2   : > { %v1031_v39 = vadd.f32 %v1030_v36, %v2937_v48  ;;  %1341 = vmatprep.mubr.f32.mxu0 %v1118_v29 }
 0x2c3   : > { %1342 = vmatmul.mubr.f32.gmra.mrb[80].mxu0 %v1117_v32  ;;  %v1119_v5 = vmax.f32 %v1029_v35, 0.0 }
 0x2c4   : > { %v1120_v12 = vmax.f32 %v1031_v39, 0.0  ;;  %v1034_v42 = vpop.f32.mrb[84].mxu1 }
 0x2c5   : > { %v1035_v44 = vadd.f32 %v1034_v42, %v2933_v47  ;;  %v1036_v6 = vpop.f32.mrb[85].mxu1 }
 0x2c6   : > { %v1037_v45 = vadd.f32 %v1036_v6, %v2937_v48  ;;  %1347 = vmatprep.mubr.f32.mxu0 %v1120_v12 }
 0x2c7   : > { %1348 = vmatmul.mubr.f32.gmra.mrb[82].mxu0 %v1119_v5  ;;  %v1121_v11 = vmax.f32 %v1035_v44, 0.0 }
 0x2c8   : > { %v1122_v46 = vmax.f32 %v1037_v45, 0.0  ;;  %v1040_v23 = vpop.f32.mrb[86].mxu1 }
 0x2c9   : > { %v1041_v33 = vadd.f32 %v1040_v23, %v2933_v47  ;;  %v1042_v20 = vpop.f32.mrb[87].mxu1 }
 0x2ca   : > { %v1043_v43 = vadd.f32 %v1042_v20, %v2937_v48  ;;  %1353 = vmatprep.mubr.f32.mxu0 %v1122_v46 }
 0x2cb   : > { %1354 = vmatmul.mubr.f32.gmra.mrb[84].mxu0 %v1121_v11  ;;  %v1123_v40 = vmax.f32 %v1041_v33, 0.0 }
 0x2cc   : > { %v1124_v30 = vmax.f32 %v1043_v43, 0.0  ;;  %v1046_v53 = vpop.f32.mrb[88].mxu1 }
 0x2cd   : > { %v1047_v63 = vadd.f32 %v1046_v53, %v2933_v47  ;;  %v1048_v50 = vpop.f32.mrb[89].mxu1 }
 0x2ce   : > { %v1049_v16 = vadd.f32 %v1048_v50, %v2937_v48  ;;  %1359 = vmatprep.mubr.f32.mxu0 %v1124_v30 }
 0x2cf   : > { %1360 = vmatmul.mubr.f32.gmra.mrb[86].mxu0 %v1123_v40  ;;  %v1125_v13 = vmax.f32 %v1047_v63, 0.0 }
 0x2d0   : > { %v1126_v60 = vmax.f32 %v1049_v16, 0.0  ;;  %v1052_v28 = vpop.f32.mrb[90].mxu1 }
 0x2d1   : > { %v1053_v41 = vadd.f32 %v1052_v28, %v2933_v47  ;;  %v1054_v25 = vpop.f32.mrb[91].mxu1 }
 0x2d2   : > { %v1055_v54 = vadd.f32 %v1054_v25, %v2937_v48  ;;  %1365 = vmatprep.mubr.f32.mxu0 %v1126_v60 }
 0x2d3   : > { %1366 = vmatmul.mubr.f32.gmra.mrb[88].mxu0 %v1125_v13  ;;  %v1127_v49 = vmax.f32 %v1053_v41, 0.0 }
 0x2d4   : > { %v1128_v37 = vmax.f32 %v1055_v54, 0.0  ;;  %v1058_v7 = vpop.f32.mrb[92].mxu1 }
 0x2d5   : > { %v1059_v22 = vadd.f32 %v1058_v7, %v2933_v47  ;;  %v1060_v62 = vpop.f32.mrb[93].mxu1 }
 0x2d6   : > { %v1061_v38 = vadd.f32 %v1060_v62, %v2937_v48  ;;  %1371 = vmatprep.mubr.f32.mxu0 %v1128_v37 }
 0x2d7   : > { %1372 = vmatmul.mubr.f32.gmra.mrb[90].mxu0 %v1127_v49  ;;  %v1129_v51 = vmax.f32 %v1059_v22, 0.0 }
 0x2d8   : > { %v1130_v18 = vmax.f32 %v1061_v38, 0.0  ;;  %v1064_v34 = vpop.f32.mrb[94].mxu1 }
 0x2d9   : > { %v1065_v52 = vadd.f32 %v1064_v34, %v2933_v47  ;;  %v1066_v55 = vpop.f32.mrb[95].mxu1 }
 0x2da   : > { %v1067_v56 = vadd.f32 %v1066_v55, %v2937_v48  ;;  %1377 = vmatprep.mubr.f32.mxu0 %v1130_v18 }
 0x2db   : > { %1378 = vmatmul.mubr.f32.gmra.mrb[92].mxu0 %v1129_v51  ;;  %v1131_v58 = vmax.f32 %v1065_v52, 0.0 }
 0x2dc   : > { %v1132_v57 = vmax.f32 %v1067_v56, 0.0 }
 0x2de   : > { %1383 = vmatprep.mubr.f32.mxu0 %v1132_v57 }
 0x2df   : > { %1384 = vmatmul.mubr.f32.gmra.mrb[94].mxu0 %v1131_v58 }
 0x336   : > { %v1199_v59 = vpop.f32.mrb[32].mxu0 }
 0x337   : > { %v1200_v61 = vadd.f32 %v1199_v59, %v2933_v47  ;;  %v1201_v0 = vpop.f32.mrb[33].mxu0 }
 0x338   : > { %v1202_v3 = vadd.f32 %v1201_v0, %v2937_v48 }
 0x339   : > { %v3005_v2 = vmax.f32 %v1200_v61, 0.0 }
 0x33a   : > { %v3007_v1 = vmax.f32 %v1202_v3, 0.0  ;;  %v1205_v4 = vpop.f32.mrb[34].mxu0 }
 0x33b   : > { %v1206_v8 = vadd.f32 %v1205_v4, %v2933_v47  ;;  %v1207_v9 = vpop.f32.mrb[35].mxu0  ;;  %v1454_v10 = vmul.f32 %v3005_v2, %v3005_v2 }
 0x33c   : > { %v1208_v14 = vadd.f32 %v1207_v9, %v2937_v48  ;;  %v1455_v15 = vmul.f32 %v3007_v1, %v3007_v1 }
 0x33d   : > { %v3015_v17 = vmax.f32 %v1206_v8, 0.0 }
 0x33e   : > { %v3017_v19 = vmax.f32 %v1208_v14, 0.0  ;;  %v1211_v21 = vpop.f32.mrb[36].mxu0  ;;  %v1518_v24 = vadd.f32 %v1455_v15, %v1454_v10 }
 0x33f   : > { %v1456_v26 = vmul.f32 %v3015_v17, %v3015_v17  ;;  %v1212_v27 = vadd.f32 %v1211_v21, %v2933_v47  ;;  %v1213_v29 = vpop.f32.mrb[37].mxu0 }
 0x340   : > { %v1457_v31 = vmul.f32 %v3017_v19, %v3017_v19  ;;  %v1214_v32 = vadd.f32 %v1213_v29, %v2937_v48  ;;  %1519 = vadd.xlane.f32.xlu0 %v1518_v24 }
 0x341   : > { %v3025_v35 = vmax.f32 %v1212_v27, 0.0 }
 0x342   : > { %v3027_v36 = vmax.f32 %v1214_v32, 0.0  ;;  %v1217_v39 = vpop.f32.mrb[38].mxu0  ;;  %v1521_v12 = vadd.f32 %v1457_v31, %v1456_v26 }
 0x343   : > { %v1218_v42 = vadd.f32 %v1217_v39, %v2933_v47  ;;  %v1219_v5 = vpop.f32.mrb[39].mxu0  ;;  %v1458_v44 = vmul.f32 %v3025_v35, %v3025_v35 }
 0x344   : > { %v1220_v6 = vadd.f32 %v1219_v5, %v2937_v48  ;;  %1522 = vadd.xlane.f32.xlu0 %v1521_v12  ;;  %v1459_v45 = vmul.f32 %v3027_v36, %v3027_v36 }
 0x345   : > { %v3035_v46 = vmax.f32 %v1218_v42, 0.0 }
 0x346   : > { %v3037_v23 = vmax.f32 %v1220_v6, 0.0  ;;  %v1223_v11 = vpop.f32.mrb[40].mxu0  ;;  %v1524_v33 = vadd.f32 %v1459_v45, %v1458_v44 }
 0x347   : > { %v1460_v20 = vmul.f32 %v3035_v46, %v3035_v46  ;;  %v1224_v43 = vadd.f32 %v1223_v11, %v2933_v47  ;;  %v1225_v30 = vpop.f32.mrb[41].mxu0 }
 0x348   : > { %v1461_v53 = vmul.f32 %v3037_v23, %v3037_v23  ;;  %v1226_v40 = vadd.f32 %v1225_v30, %v2937_v48  ;;  %1525 = vadd.xlane.f32.xlu1 %v1524_v33 }
 0x349   : > { %v3045_v63 = vmax.f32 %v1224_v43, 0.0 }
 0x34a   : > { %v3047_v50 = vmax.f32 %v1226_v40, 0.0  ;;  %v1229_v16 = vpop.f32.mrb[42].mxu0  ;;  %v1527_v60 = vadd.f32 %v1461_v53, %v1460_v20 }
 0x34b   : > { %v1462_v28 = vmul.f32 %v3045_v63, %v3045_v63  ;;  %v1230_v13 = vadd.f32 %v1229_v16, %v2933_v47  ;;  %v1231_v41 = vpop.f32.mrb[43].mxu0 }
 0x34c   : > { %v1463_v25 = vmul.f32 %v3047_v50, %v3047_v50  ;;  %v1232_v54 = vadd.f32 %v1231_v41, %v2937_v48  ;;  %1528 = vadd.xlane.f32.xlu1 %v1527_v60 }
 0x34d   : > { %v3055_v37 = vmax.f32 %v1230_v13, 0.0 }
 0x34e   : > { %v3057_v7 = vmax.f32 %v1232_v54, 0.0  ;;  %v1235_v49 = vpop.f32.mrb[44].mxu0  ;;  %v1530_v22 = vadd.f32 %v1463_v25, %v1462_v28 }
 0x34f   : > { %v1464_v62 = vmul.f32 %v3055_v37, %v3055_v37  ;;  %v1236_v38 = vadd.f32 %v1235_v49, %v2933_v47  ;;  %v1237_v18 = vpop.f32.mrb[45].mxu0 }
 0x350   : > { %v1465_v34 = vmul.f32 %v3057_v7, %v3057_v7  ;;  %v1238_v51 = vadd.f32 %v1237_v18, %v2937_v48  ;;  %1531 = vadd.xlane.f32.xlu0 %v1530_v22 }
 0x351   : > { %v3065_v52 = vmax.f32 %v1236_v38, 0.0 }
 0x352   : > { %v3067_v55 = vmax.f32 %v1238_v51, 0.0  ;;  %v1241_v56 = vpop.f32.mrb[46].mxu0  ;;  %v1533_v57 = vadd.f32 %v1465_v34, %v1464_v62 }
 0x353   : > { %v1466_v58 = vmul.f32 %v3065_v52, %v3065_v52  ;;  %v1242_v59 = vadd.f32 %v1241_v56, %v2933_v47  ;;  %v1243_v61 = vpop.f32.mrb[47].mxu0 }
 0x354   : > { %v1467_v0 = vmul.f32 %v3067_v55, %v3067_v55  ;;  %v1244_v3 = vadd.f32 %v1243_v61, %v2937_v48  ;;  %1534 = vadd.xlane.f32.xlu1 %v1533_v57 }
 0x355   : > { %v3075_v4 = vmax.f32 %v1242_v59, 0.0 }
 0x356   : > { %v3077_v8 = vmax.f32 %v1244_v3, 0.0  ;;  %v1247_v9 = vpop.f32.mrb[48].mxu0  ;;  %v1536_v10 = vadd.f32 %v1467_v0, %v1466_v58 }
 0x357   : > { %v1468_v14 = vmul.f32 %v3075_v4, %v3075_v4  ;;  %v1248_v15 = vadd.f32 %v1247_v9, %v2933_v47  ;;  %v1249_v21 = vpop.f32.mrb[49].mxu0 }
 0x358   : > { %v1469_v24 = vmul.f32 %v3077_v8, %v3077_v8  ;;  %v1250_v26 = vadd.f32 %v1249_v21, %v2937_v48  ;;  %1537 = vadd.xlane.f32.xlu0 %v1536_v10 }
 0x359   : > { %v3085_v27 = vmax.f32 %v1248_v15, 0.0 }
 0x35a   : > { %v3087_v29 = vmax.f32 %v1250_v26, 0.0  ;;  %v1253_v31 = vpop.f32.mrb[50].mxu0  ;;  %v1539_v32 = vadd.f32 %v1469_v24, %v1468_v14 }
 0x35b   : > { %v1470_v39 = vmul.f32 %v3085_v27, %v3085_v27  ;;  %v1254_v12 = vadd.f32 %v1253_v31, %v2933_v47  ;;  %v1255_v42 = vpop.f32.mrb[51].mxu0 }
 0x35c   : > { %v1471_v5 = vmul.f32 %v3087_v29, %v3087_v29  ;;  %v1256_v44 = vadd.f32 %v1255_v42, %v2937_v48  ;;  %1540 = vadd.xlane.f32.xlu1 %v1539_v32 }
 0x35d   : > { %v3095_v6 = vmax.f32 %v1254_v12, 0.0 }
 0x35e   : > { %v3097_v45 = vmax.f32 %v1256_v44, 0.0  ;;  %v1259_v11 = vpop.f32.mrb[52].mxu0  ;;  %v1542_v33 = vadd.f32 %v1471_v5, %v1470_v39 }
 0x35f   : > { %v1472_v20 = vmul.f32 %v3095_v6, %v3095_v6  ;;  %v1260_v43 = vadd.f32 %v1259_v11, %v2933_v47  ;;  %v1261_v30 = vpop.f32.mrb[53].mxu0 }
 0x360   : > { %v1473_v53 = vmul.f32 %v3097_v45, %v3097_v45  ;;  %v1262_v40 = vadd.f32 %v1261_v30, %v2937_v48  ;;  %1543 = vadd.xlane.f32.xlu0 %v1542_v33 }
 0x361   : > { %v3105_v16 = vmax.f32 %v1260_v43, 0.0 }
 0x362   : > { %v3107_v60 = vmax.f32 %v1262_v40, 0.0  ;;  %v1265_v28 = vpop.f32.mrb[54].mxu0  ;;  %v1545_v13 = vadd.f32 %v1473_v53, %v1472_v20 }
 0x363   : > { %v1474_v41 = vmul.f32 %v3105_v16, %v3105_v16  ;;  %v1266_v25 = vadd.f32 %v1265_v28, %v2933_v47  ;;  %v1267_v54 = vpop.f32.mrb[55].mxu0 }
 0x364   : > { %v1475_v49 = vmul.f32 %v3107_v60, %v3107_v60  ;;  %v1268_v22 = vadd.f32 %v1267_v54, %v2937_v48  ;;  %1546 = vadd.xlane.f32.xlu1 %v1545_v13 }
 0x365   : > { %v3115_v62 = vmax.f32 %v1266_v25, 0.0 }
 0x366   : > { %v3117_v38 = vmax.f32 %v1268_v22, 0.0  ;;  %v1271_v18 = vpop.f32.mrb[56].mxu0  ;;  %v1548_v34 = vadd.f32 %v1475_v49, %v1474_v41 }
 0x367   : > { %v1476_v51 = vmul.f32 %v3115_v62, %v3115_v62  ;;  %v1272_v56 = vadd.f32 %v1271_v18, %v2933_v47  ;;  %v1273_v57 = vpop.f32.mrb[57].mxu0 }
 0x368   : > { %v1477_v58 = vmul.f32 %v3117_v38, %v3117_v38  ;;  %v1274_v59 = vadd.f32 %v1273_v57, %v2937_v48  ;;  %1549 = vadd.xlane.f32.xlu0 %v1548_v34 }
 0x369   : > { %v3125_v61 = vmax.f32 %v1272_v56, 0.0 }
 0x36a   : > { %v3127_v0 = vmax.f32 %v1274_v59, 0.0  ;;  %v1277_v3 = vpop.f32.mrb[58].mxu0  ;;  %v1551_v9 = vadd.f32 %v1477_v58, %v1476_v51 }
 0x36b   : > { %v1478_v10 = vmul.f32 %v3125_v61, %v3125_v61  ;;  %v1278_v14 = vadd.f32 %v1277_v3, %v2933_v47  ;;  %v1279_v15 = vpop.f32.mrb[59].mxu0 }
 0x36c   : > { %v1479_v21 = vmul.f32 %v3127_v0, %v3127_v0  ;;  %v1280_v24 = vadd.f32 %v1279_v15, %v2937_v48  ;;  %1552 = vadd.xlane.f32.xlu1 %v1551_v9 }
 0x36d   : > { %v3135_v26 = vmax.f32 %v1278_v14, 0.0 }
 0x36e   : > { %v3137_v31 = vmax.f32 %v1280_v24, 0.0  ;;  %v1283_v32 = vpop.f32.mrb[60].mxu0  ;;  %v1554_v39 = vadd.f32 %v1479_v21, %v1478_v10 }
 0x36f   : > { %v1480_v12 = vmul.f32 %v3135_v26, %v3135_v26  ;;  %v1284_v42 = vadd.f32 %v1283_v32, %v2933_v47  ;;  %v1285_v5 = vpop.f32.mrb[61].mxu0 }
 0x370   : > { %v1481_v44 = vmul.f32 %v3137_v31, %v3137_v31  ;;  %v1286_v11 = vadd.f32 %v1285_v5, %v2937_v48  ;;  %1555 = vadd.xlane.f32.xlu0 %v1554_v39 }
 0x371   : > { %v3145_v33 = vmax.f32 %v1284_v42, 0.0 }
 0x372   : > { %v3147_v20 = vmax.f32 %v1286_v11, 0.0  ;;  %v1289_v43 = vpop.f32.mrb[62].mxu0  ;;  %v1557_v30 = vadd.f32 %v1481_v44, %v1480_v12 }
 0x373   : > { %v1482_v53 = vmul.f32 %v3145_v33, %v3145_v33  ;;  %v1290_v40 = vadd.f32 %v1289_v43, %v2933_v47  ;;  %v1291_v28 = vpop.f32.mrb[63].mxu0 }
 0x374   : > { %v1483_v13 = vmul.f32 %v3147_v20, %v3147_v20  ;;  %v1292_v41 = vadd.f32 %v1291_v28, %v2937_v48  ;;  %1558 = vadd.xlane.f32.xlu1 %v1557_v30 }
 0x375   : > { %v3155_v25 = vmax.f32 %v1290_v40, 0.0 }
 0x376   : > { %v3157_v54 = vmax.f32 %v1292_v41, 0.0  ;;  %v1295_v49 = vpop.f32.mrb[64].mxu0  ;;  %v1560_v22 = vadd.f32 %v1483_v13, %v1482_v53 }
 0x377   : > { %v1484_v18 = vmul.f32 %v3155_v25, %v3155_v25  ;;  %v1296_v34 = vadd.f32 %v1295_v49, %v2933_v47  ;;  %v1297_v51 = vpop.f32.mrb[65].mxu0 }
 0x378   : > { %v1485_v56 = vmul.f32 %v3157_v54, %v3157_v54  ;;  %v1298_v57 = vadd.f32 %v1297_v51, %v2937_v48  ;;  %1561 = vadd.xlane.f32.xlu0 %v1560_v22 }
 0x379   : > { %v3165_v58 = vmax.f32 %v1296_v34, 0.0 }
 0x37a   : > { %v3167_v59 = vmax.f32 %v1298_v57, 0.0  ;;  %v1301_v3 = vpop.f32.mrb[66].mxu0  ;;  %v1563_v9 = vadd.f32 %v1485_v56, %v1484_v18 }
 0x37b   : > { %v1486_v10 = vmul.f32 %v3165_v58, %v3165_v58  ;;  %v1302_v14 = vadd.f32 %v1301_v3, %v2933_v47  ;;  %v1303_v15 = vpop.f32.mrb[67].mxu0 }
 0x37c   : > { %v1487_v21 = vmul.f32 %v3167_v59, %v3167_v59  ;;  %v1304_v24 = vadd.f32 %v1303_v15, %v2937_v48  ;;  %1564 = vadd.xlane.f32.xlu1 %v1563_v9 }
 0x37d   : > { %v3175_v32 = vmax.f32 %v1302_v14, 0.0 }
 0x37e   : > { %v3177_v39 = vmax.f32 %v1304_v24, 0.0  ;;  %v1307_v12 = vpop.f32.mrb[68].mxu0  ;;  %v1566_v42 = vadd.f32 %v1487_v21, %v1486_v10 }
 0x37f   : > { %v1488_v5 = vmul.f32 %v3175_v32, %v3175_v32  ;;  %v1308_v44 = vadd.f32 %v1307_v12, %v2933_v47  ;;  %v1309_v11 = vpop.f32.mrb[69].mxu0 }
 0x380   : > { %v1489_v43 = vmul.f32 %v3177_v39, %v3177_v39  ;;  %v1310_v30 = vadd.f32 %v1309_v11, %v2937_v48  ;;  %1567 = vadd.xlane.f32.xlu0 %v1566_v42 }
 0x381   : > { %v3185_v53 = vmax.f32 %v1308_v44, 0.0 }
 0x382   : > { %v3187_v40 = vmax.f32 %v1310_v30, 0.0  ;;  %v1313_v28 = vpop.f32.mrb[70].mxu0  ;;  %v1569_v13 = vadd.f32 %v1489_v43, %v1488_v5 }
 0x383   : > { %v1490_v41 = vmul.f32 %v3185_v53, %v3185_v53  ;;  %v1314_v49 = vadd.f32 %v1313_v28, %v2933_v47  ;;  %v1315_v22 = vpop.f32.mrb[71].mxu0 }
 0x384   : > { %v1491_v18 = vmul.f32 %v3187_v40, %v3187_v40  ;;  %v1316_v34 = vadd.f32 %v1315_v22, %v2937_v48  ;;  %1570 = vadd.xlane.f32.xlu1 %v1569_v13 }
 0x385   : > { %v3195_v51 = vmax.f32 %v1314_v49, 0.0 }
 0x386   : > { %v3197_v56 = vmax.f32 %v1316_v34, 0.0  ;;  %v1319_v57 = vpop.f32.mrb[72].mxu0  ;;  %v1572_v3 = vadd.f32 %v1491_v18, %v1490_v41 }
 0x387   : > { %v1492_v9 = vmul.f32 %v3195_v51, %v3195_v51  ;;  %v1320_v10 = vadd.f32 %v1319_v57, %v2933_v47  ;;  %v1321_v14 = vpop.f32.mrb[73].mxu0 }
 0x388   : > { %v1493_v15 = vmul.f32 %v3197_v56, %v3197_v56  ;;  %v1322_v21 = vadd.f32 %v1321_v14, %v2937_v48  ;;  %1573 = vadd.xlane.f32.xlu0 %v1572_v3 }
 0x389   : > { %v3205_v24 = vmax.f32 %v1320_v10, 0.0 }
 0x38a   : > { %v3207_v12 = vmax.f32 %v1322_v21, 0.0  ;;  %v1325_v42 = vpop.f32.mrb[74].mxu0  ;;  %v1575_v5 = vadd.f32 %v1493_v15, %v1492_v9 }
 0x38b   : > { %v1494_v44 = vmul.f32 %v3205_v24, %v3205_v24  ;;  %v1326_v11 = vadd.f32 %v1325_v42, %v2933_v47  ;;  %v1327_v43 = vpop.f32.mrb[75].mxu0 }
 0x38c   : > { %v1495_v30 = vmul.f32 %v3207_v12, %v3207_v12  ;;  %v1328_v28 = vadd.f32 %v1327_v43, %v2937_v48  ;;  %1576 = vadd.xlane.f32.xlu1 %v1575_v5 }
 0x38d   : > { %v3215_v13 = vmax.f32 %v1326_v11, 0.0 }
 0x38e   : > { %v3217_v41 = vmax.f32 %v1328_v28, 0.0  ;;  %v1331_v49 = vpop.f32.mrb[76].mxu0  ;;  %v1578_v22 = vadd.f32 %v1495_v30, %v1494_v44 }
 0x38f   : > { %v1496_v18 = vmul.f32 %v3215_v13, %v3215_v13  ;;  %v1332_v34 = vadd.f32 %v1331_v49, %v2933_v47  ;;  %v1333_v57 = vpop.f32.mrb[77].mxu0 }
 0x390   : > { %v1497_v3 = vmul.f32 %v3217_v41, %v3217_v41  ;;  %v1334_v9 = vadd.f32 %v1333_v57, %v2937_v48  ;;  %1579 = vadd.xlane.f32.xlu0 %v1578_v22 }
 0x391   : > { %v3225_v10 = vmax.f32 %v1332_v34, 0.0 }
 0x392   : > { %v3227_v14 = vmax.f32 %v1334_v9, 0.0  ;;  %v1337_v15 = vpop.f32.mrb[78].mxu0  ;;  %v1581_v21 = vadd.f32 %v1497_v3, %v1496_v18 }
 0x393   : > { %v1498_v42 = vmul.f32 %v3225_v10, %v3225_v10  ;;  %v1338_v5 = vadd.f32 %v1337_v15, %v2933_v47  ;;  %v1339_v44 = vpop.f32.mrb[79].mxu0 }
 0x394   : > { %v1499_v11 = vmul.f32 %v3227_v14, %v3227_v14  ;;  %v1340_v43 = vadd.f32 %v1339_v44, %v2937_v48  ;;  %1582 = vadd.xlane.f32.xlu1 %v1581_v21 }
 0x395   : > { %v3235_v30 = vmax.f32 %v1338_v5, 0.0 }
 0x396   : > { %v3237_v28 = vmax.f32 %v1340_v43, 0.0  ;;  %v1343_v49 = vpop.f32.mrb[80].mxu0  ;;  %v1584_v22 = vadd.f32 %v1499_v11, %v1498_v42 }
 0x397   : > { %v1500_v18 = vmul.f32 %v3235_v30, %v3235_v30  ;;  %v1344_v34 = vadd.f32 %v1343_v49, %v2933_v47  ;;  %v1345_v57 = vpop.f32.mrb[81].mxu0 }
 0x398   : > { %3540 = vst [vmem:[#allocation12_spill] sm:$0xff] %v3237_v28  ;;  %v1501_v3 = vmul.f32 %v3237_v28, %v3237_v28  ;;  %v1346_v9 = vadd.f32 %v1345_v57, %v2937_v48  ;;  %1585 = vadd.xlane.f32.xlu0 %v1584_v22 }
 0x399   : > { %v3245_v15 = vmax.f32 %v1344_v34, 0.0 }
 0x39a   : > { %v3247_v21 = vmax.f32 %v1346_v9, 0.0  ;;  %v1349_v5 = vpop.f32.mrb[82].mxu0  ;;  %v1587_v44 = vadd.f32 %v1501_v3, %v1500_v18 }
 0x39b   : > { %3541 = vst [vmem:[#allocation13_spill] sm:$0xff] %v3245_v15  ;;  %v1502_v42 = vmul.f32 %v3245_v15, %v3245_v15  ;;  %v1350_v11 = vadd.f32 %v1349_v5, %v2933_v47  ;;  %v1351_v43 = vpop.f32.mrb[83].mxu0 }
 0x39c   : > { %3542 = vst [vmem:[#allocation14_spill] sm:$0xff] %v3247_v21  ;;  %v1503_v49 = vmul.f32 %v3247_v21, %v3247_v21  ;;  %v1352_v28 = vadd.f32 %v1351_v43, %v2937_v48  ;;  %1588 = vadd.xlane.f32.xlu1 %v1587_v44 }
 0x39d   : > { %v3255_v57 = vmax.f32 %v1350_v11, 0.0 }
 0x39e   : > { %v3257_v22 = vmax.f32 %v1352_v28, 0.0  ;;  %v1355_v34 = vpop.f32.mrb[84].mxu0  ;;  %v1590_v9 = vadd.f32 %v1503_v49, %v1502_v42 }
 0x39f   : > { %3543 = vst [vmem:[#allocation15_spill] sm:$0xff] %v3255_v57  ;;  %v1504_v18 = vmul.f32 %v3255_v57, %v3255_v57  ;;  %v1356_v3 = vadd.f32 %v1355_v34, %v2933_v47  ;;  %v1357_v15 = vpop.f32.mrb[85].mxu0 }
 0x3a0   : > { %3544 = vst [vmem:[#allocation16_spill] sm:$0xff] %v3257_v22  ;;  %v1505_v5 = vmul.f32 %v3257_v22, %v3257_v22  ;;  %v1358_v21 = vadd.f32 %v1357_v15, %v2937_v48  ;;  %1591 = vadd.xlane.f32.xlu0 %v1590_v9 }
 0x3a1   : > { %v3265_v43 = vmax.f32 %v1356_v3, 0.0 }
 0x3a2   : > { %v3267_v44 = vmax.f32 %v1358_v21, 0.0  ;;  %v1361_v28 = vpop.f32.mrb[86].mxu0  ;;  %v1593_v11 = vadd.f32 %v1505_v5, %v1504_v18 }
 0x3a3   : > { %3545 = vst [vmem:[#allocation17_spill] sm:$0xff] %v3265_v43  ;;  %v1506_v42 = vmul.f32 %v3265_v43, %v3265_v43  ;;  %v1362_v49 = vadd.f32 %v1361_v28, %v2933_v47  ;;  %v1363_v57 = vpop.f32.mrb[87].mxu0 }
 0x3a4   : > { %3546 = vst [vmem:[#allocation18_spill] sm:$0xff] %v3267_v44  ;;  %v1507_v34 = vmul.f32 %v3267_v44, %v3267_v44  ;;  %v1364_v22 = vadd.f32 %v1363_v57, %v2937_v48  ;;  %1594 = vadd.xlane.f32.xlu1 %v1593_v11 }
 0x3a5   : > { %v3275_v15 = vmax.f32 %v1362_v49, 0.0 }
 0x3a6   : > { %v3277_v9 = vmax.f32 %v1364_v22, 0.0  ;;  %v1367_v21 = vpop.f32.mrb[88].mxu0  ;;  %v1596_v3 = vadd.f32 %v1507_v34, %v1506_v42 }
 0x3a7   : > { %3547 = vst [vmem:[#allocation19_spill] sm:$0xff] %v3275_v15  ;;  %v1508_v18 = vmul.f32 %v3275_v15, %v3275_v15  ;;  %v1368_v5 = vadd.f32 %v1367_v21, %v2933_v47  ;;  %v1369_v43 = vpop.f32.mrb[89].mxu0 }
 0x3a8   : > { %3548 = vst [vmem:[#allocation20_spill] sm:$0xff] %v3277_v9  ;;  %v1509_v28 = vmul.f32 %v3277_v9, %v3277_v9  ;;  %v1370_v44 = vadd.f32 %v1369_v43, %v2937_v48  ;;  %1597 = vadd.xlane.f32.xlu0 %v1596_v3 }
 0x3a9   : > { %v3285_v57 = vmax.f32 %v1368_v5, 0.0 }
 0x3aa   : > { %v3287_v11 = vmax.f32 %v1370_v44, 0.0  ;;  %v1373_v22 = vpop.f32.mrb[90].mxu0  ;;  %v1599_v49 = vadd.f32 %v1509_v28, %v1508_v18 }
 0x3ab   : > { %3549 = vst [vmem:[#allocation21_spill] sm:$0xff] %v3285_v57  ;;  %v1510_v42 = vmul.f32 %v3285_v57, %v3285_v57  ;;  %v1374_v34 = vadd.f32 %v1373_v22, %v2933_v47  ;;  %v1375_v15 = vpop.f32.mrb[91].mxu0 }
 0x3ac   : > { %3550 = vst [vmem:[#allocation22_spill] sm:$0xff] %v3287_v11  ;;  %v1511_v21 = vmul.f32 %v3287_v11, %v3287_v11  ;;  %v1376_v9 = vadd.f32 %v1375_v15, %v2937_v48  ;;  %1600 = vadd.xlane.f32.xlu1 %v1599_v49 }
 0x3ad   : > { %v3295_v43 = vmax.f32 %v1374_v34, 0.0 }
 0x3ae   : > { %v3297_v3 = vmax.f32 %v1376_v9, 0.0  ;;  %v1379_v44 = vpop.f32.mrb[92].mxu0  ;;  %v1602_v5 = vadd.f32 %v1511_v21, %v1510_v42 }
 0x3af   : > { %3551 = vst [vmem:[#allocation23_spill] sm:$0xff] %v3295_v43  ;;  %v1512_v18 = vmul.f32 %v3295_v43, %v3295_v43  ;;  %v1380_v28 = vadd.f32 %v1379_v44, %v2933_v47  ;;  %v1381_v57 = vpop.f32.mrb[93].mxu0 }
 0x3b0   : > { %3552 = vst [vmem:[#allocation24_spill] sm:$0xff] %v3297_v3  ;;  %v1513_v22 = vmul.f32 %v3297_v3, %v3297_v3  ;;  %v1382_v11 = vadd.f32 %v1381_v57, %v2937_v48  ;;  %1603 = vadd.xlane.f32.xlu0 %v1602_v5 }
 0x3b1   : > { %v3305_v15 = vmax.f32 %v1380_v28, 0.0 }
 0x3b2   : > { %v3307_v49 = vmax.f32 %v1382_v11, 0.0  ;;  %v1385_v9 = vpop.f32.mrb[94].mxu0  ;;  %v1605_v34 = vadd.f32 %v1513_v22, %v1512_v18 }
 0x3b3   : > { %v1514_v42 = vmul.f32 %v3305_v15, %v3305_v15  ;;  %v1386_v21 = vadd.f32 %v1385_v9, %v2933_v47  ;;  %v1387_v43 = vpop.f32.mrb[95].mxu0 }
 0x3b4   : > { %v1515_v44 = vmul.f32 %v3307_v49, %v3307_v49  ;;  %v1388_v3 = vadd.f32 %v1387_v43, %v2937_v48  ;;  %1606 = vadd.xlane.f32.xlu1 %v1605_v34 }
 0x3b5   : > { %v3315_v57 = vmax.f32 %v1386_v21, 0.0 }
 0x3b6   : > { %v3317_v5 = vmax.f32 %v1388_v3, 0.0  ;;  %v1608_v11 = vadd.f32 %v1515_v44, %v1514_v42 }
 0x3b7   : > { %3553 = vst [vmem:[#allocation25_spill] sm:$0xff] %v3315_v57  ;;  %v1516_v18 = vmul.f32 %v3315_v57, %v3315_v57 }
 0x3b8   : > { %3554 = vst [vmem:[#allocation26_spill] sm:$0xff] %v3317_v5  ;;  %v1517_v28 = vmul.f32 %v3317_v5, %v3317_v5  ;;  %1609 = vadd.xlane.f32.xlu0 %v1608_v11 }
 0x3ba   : > { %v1611_v47 = vadd.f32 %v1517_v28, %v1516_v18 }
 0x3bc   : > { %1612 = vadd.xlane.f32.xlu1 %v1611_v47 }
 0x3cd   : > { %v1520_v22 = vpop.xlane.xlu0 %1519 }
 0x3ce   : > { %v1614_v9 = vmax.f32 %v1520_v22, 1e-24 }
 0x3d0   : > { %2232 = vrsqrt.f32 %v1614_v9 }
 0x3d1   : > { %v1523_v48 = vpop.xlane.xlu0 %1522 }
 0x3d2   : > { %v1615_v43 = vmax.f32 %v1523_v48, 1e-24 }
 0x3d4   : > { %2234 = vrsqrt.f32 %v1615_v43 }
 0x3d5   : > { %v1526_v34 = vpop.xlane.xlu1 %1525 }
 0x3d6   : > { %v1616_v3 = vmax.f32 %v1526_v34, 1e-24 }
 0x3d8   : > { %2236 = vrsqrt.f32 %v1616_v3 }
 0x3d9   : > { %v1529_v42 = vpop.xlane.xlu1 %1528 }
 0x3da   : > { %v2233_v21 = vpop.eup %2232  ;;  %v1617_v44 = vmax.f32 %v1529_v42, 1e-24 }
 0x3db   : > { %v1678_v57 = vmul.f32 %v2233_v21, %v3005_v2  ;;  %v1679_v5 = vmul.f32 %v2233_v21, %v3007_v1 }
 0x3dc   : > { %2238 = vrsqrt.f32 %v1617_v44 }
 0x3dd   : > { %1742 = vst [vmem:[%s3327_s10] sm:$0xff] %v1678_v57  ;;  %1743 = vst [vmem:[%s3327_s10 + $0x8] sm:$0xff] %v1679_v5  ;;  %v1532_v11 = vpop.xlane.xlu0 %1531 }
 0x3de   : > { %v2235_v18 = vpop.eup %2234  ;;  %v1618_v28 = vmax.f32 %v1532_v11, 1e-24 }
 0x3df   : > { %v1680_v47 = vmul.f32 %v2235_v18, %v3015_v17  ;;  %v1681_v2 = vmul.f32 %v2235_v18, %v3017_v19 }
 0x3e0   : > { %2240 = vrsqrt.f32 %v1618_v28 }
 0x3e1   : > { %1744 = vst [vmem:[%s3327_s10 + $0x10] sm:$0xff] %v1680_v47  ;;  %1745 = vst [vmem:[%s3327_s10 + $0x18] sm:$0xff] %v1681_v2  ;;  %v1535_v1 = vpop.xlane.xlu1 %1534 }
 0x3e2   : > { %v2237_v22 = vpop.eup %2236  ;;  %v1619_v9 = vmax.f32 %v1535_v1, 1e-24 }
 0x3e3   : > { %v1682_v57 = vmul.f32 %v2237_v22, %v3025_v35  ;;  %v1683_v5 = vmul.f32 %v2237_v22, %v3027_v36 }
 0x3e4   : > { %2242 = vrsqrt.f32 %v1619_v9 }
 0x3e5   : > { %1746 = vst [vmem:[%s3327_s10 + $0x20] sm:$0xff] %v1682_v57  ;;  %1747 = vst [vmem:[%s3327_s10 + $0x28] sm:$0xff] %v1683_v5  ;;  %v1538_v17 = vpop.xlane.xlu0 %1537 }
 0x3e6   : > { %v2239_v48 = vpop.eup %2238  ;;  %v1620_v19 = vmax.f32 %v1538_v17, 1e-24 }
 0x3e7   : > { %v1684_v43 = vmul.f32 %v2239_v48, %v3035_v46  ;;  %v1685_v34 = vmul.f32 %v2239_v48, %v3037_v23 }
 0x3e8   : > { %2244 = vrsqrt.f32 %v1620_v19 }
 0x3e9   : > { %1748 = vst [vmem:[%s3327_s10 + $0x30] sm:$0xff] %v1684_v43  ;;  %1749 = vst [vmem:[%s3327_s10 + $0x38] sm:$0xff] %v1685_v34  ;;  %v1541_v35 = vpop.xlane.xlu1 %1540 }
 0x3ea   : > { %v2241_v3 = vpop.eup %2240  ;;  %v1621_v36 = vmax.f32 %v1541_v35, 1e-24 }
 0x3eb   : > { %v1686_v42 = vmul.f32 %v2241_v3, %v3045_v63  ;;  %v1687_v21 = vmul.f32 %v2241_v3, %v3047_v50 }
 0x3ec   : > { %2246 = vrsqrt.f32 %v1621_v36 }
 0x3ed   : > { %1750 = vst [vmem:[%s3327_s10 + $0x40] sm:$0xff] %v1686_v42  ;;  %1751 = vst [vmem:[%s3327_s10 + $0x48] sm:$0xff] %v1687_v21  ;;  %v1544_v46 = vpop.xlane.xlu0 %1543 }
 0x3ee   : > { %v2243_v44 = vpop.eup %2242  ;;  %v1622_v23 = vmax.f32 %v1544_v46, 1e-24 }
 0x3ef   : > { %v1688_v11 = vmul.f32 %v2243_v44, %v3055_v37  ;;  %v1689_v18 = vmul.f32 %v2243_v44, %v3057_v7 }
 0x3f0   : > { %2248 = vrsqrt.f32 %v1622_v23 }
 0x3f1   : > { %1752 = vst [vmem:[%s3327_s10 + $0x50] sm:$0xff] %v1688_v11  ;;  %1753 = vst [vmem:[%s3327_s10 + $0x58] sm:$0xff] %v1689_v18  ;;  %v1547_v63 = vpop.xlane.xlu1 %1546 }
 0x3f2   : > { %v2245_v28 = vpop.eup %2244  ;;  %v1623_v50 = vmax.f32 %v1547_v63, 1e-24 }
 0x3f3   : > { %v1690_v47 = vmul.f32 %v2245_v28, %v3065_v52  ;;  %v1691_v2 = vmul.f32 %v2245_v28, %v3067_v55 }
 0x3f4   : > { %2250 = vrsqrt.f32 %v1623_v50 }
 0x3f5   : > { %1754 = vst [vmem:[%s3327_s10 + $0x60] sm:$0xff] %v1690_v47  ;;  %1755 = vst [vmem:[%s3327_s10 + $0x68] sm:$0xff] %v1691_v2  ;;  %v1550_v37 = vpop.xlane.xlu0 %1549 }
 0x3f6   : > { %v2247_v1 = vpop.eup %2246  ;;  %v1624_v7 = vmax.f32 %v1550_v37, 1e-24 }
 0x3f7   : > { %v1692_v22 = vmul.f32 %v2247_v1, %v3075_v4  ;;  %v1693_v9 = vmul.f32 %v2247_v1, %v3077_v8 }
 0x3f8   : > { %2252 = vrsqrt.f32 %v1624_v7 }
 0x3f9   : > { %1756 = vst [vmem:[%s3327_s10 + $0x70] sm:$0xff] %v1692_v22  ;;  %1757 = vst [vmem:[%s3327_s10 + $0x78] sm:$0xff] %v1693_v9  ;;  %v1553_v52 = vpop.xlane.xlu1 %1552 }
 0x3fa   : > { %v2249_v57 = vpop.eup %2248  ;;  %v1625_v55 = vmax.f32 %v1553_v52, 1e-24 }
 0x3fb   : > { %v1694_v5 = vmul.f32 %v2249_v57, %v3085_v27  ;;  %v1695_v17 = vmul.f32 %v2249_v57, %v3087_v29 }
 0x3fc   : > { %2254 = vrsqrt.f32 %v1625_v55 }
 0x3fd   : > { %1758 = vst [vmem:[%s3327_s10 + $0x80] sm:$0xff] %v1694_v5  ;;  %1759 = vst [vmem:[%s3327_s10 + $0x88] sm:$0xff] %v1695_v17  ;;  %v1556_v4 = vpop.xlane.xlu0 %1555 }
 0x3fe   : > { %v2251_v48 = vpop.eup %2250  ;;  %v1626_v8 = vmax.f32 %v1556_v4, 1e-24 }
 0x3ff   : > { %v1696_v19 = vmul.f32 %v2251_v48, %v3095_v6  ;;  %v1697_v43 = vmul.f32 %v2251_v48, %v3097_v45 }
 0x400   : > { %2256 = vrsqrt.f32 %v1626_v8 }
 0x401   : > { %1760 = vst [vmem:[%s3327_s10 + $0x90] sm:$0xff] %v1696_v19  ;;  %1761 = vst [vmem:[%s3327_s10 + $0x98] sm:$0xff] %v1697_v43  ;;  %v1559_v27 = vpop.xlane.xlu1 %1558 }
 0x402   : > { %v2253_v34 = vpop.eup %2252  ;;  %v1627_v29 = vmax.f32 %v1559_v27, 1e-24 }
 0x403   : > { %v1698_v35 = vmul.f32 %v2253_v34, %v3105_v16  ;;  %v1699_v3 = vmul.f32 %v2253_v34, %v3107_v60 }
 0x404   : > { %2258 = vrsqrt.f32 %v1627_v29 }
 0x405   : > { %1762 = vst [vmem:[%s3327_s10 + $0xa0] sm:$0xff] %v1698_v35  ;;  %1763 = vst [vmem:[%s3327_s10 + $0xa8] sm:$0xff] %v1699_v3  ;;  %v1562_v6 = vpop.xlane.xlu0 %1561 }
 0x406   : > { %v2255_v36 = vpop.eup %2254  ;;  %v1628_v45 = vmax.f32 %v1562_v6, 1e-24 }
 0x407   : > { %v1700_v42 = vmul.f32 %v2255_v36, %v3115_v62  ;;  %v1701_v21 = vmul.f32 %v2255_v36, %v3117_v38 }
 0x408   : > { %2260 = vrsqrt.f32 %v1628_v45 }
 0x409   : > { %1764 = vst [vmem:[%s3327_s10 + $0xb0] sm:$0xff] %v1700_v42  ;;  %1765 = vst [vmem:[%s3327_s10 + $0xb8] sm:$0xff] %v1701_v21  ;;  %v1565_v16 = vpop.xlane.xlu1 %1564 }
 0x40a   : > { %v2257_v46 = vpop.eup %2256  ;;  %v1629_v60 = vmax.f32 %v1565_v16, 1e-24  ;;  %v3555_v16 = vld [vmem:[#allocation12_spill] sm:$0xff] }
 0x40b   : > { %v1702_v44 = vmul.f32 %v2257_v46, %v3125_v61  ;;  %v1703_v23 = vmul.f32 %v2257_v46, %v3127_v0 }
 0x40c   : > { %2262 = vrsqrt.f32 %v1629_v60 }
 0x40d   : > { %1766 = vst [vmem:[%s3327_s10 + $0xc0] sm:$0xff] %v1702_v44  ;;  %1767 = vst [vmem:[%s3327_s10 + $0xc8] sm:$0xff] %v1703_v23  ;;  %v1568_v62 = vpop.xlane.xlu0 %1567  ;;  %v3556_v44 = vld [vmem:[#allocation13_spill] sm:$0xff] }
 0x40e   : > { %v2259_v11 = vpop.eup %2258  ;;  %v1630_v38 = vmax.f32 %v1568_v62, 1e-24  ;;  %v3557_v62 = vld [vmem:[#allocation14_spill] sm:$0xff] }
 0x40f   : > { %v1704_v18 = vmul.f32 %v2259_v11, %v3135_v26  ;;  %v1705_v63 = vmul.f32 %v2259_v11, %v3137_v31 }
 0x410   : > { %2264 = vrsqrt.f32 %v1630_v38 }
 0x411   : > { %1768 = vst [vmem:[%s3327_s10 + $0xd0] sm:$0xff] %v1704_v18  ;;  %1769 = vst [vmem:[%s3327_s10 + $0xd8] sm:$0xff] %v1705_v63  ;;  %v1571_v61 = vpop.xlane.xlu1 %1570  ;;  %v3558_v63 = vld [vmem:[#allocation15_spill] sm:$0xff] }
 0x412   : > { %v2261_v28 = vpop.eup %2260  ;;  %v1631_v0 = vmax.f32 %v1571_v61, 1e-24 }
 0x413   : > { %v1706_v50 = vmul.f32 %v2261_v28, %v3145_v33  ;;  %v1707_v47 = vmul.f32 %v2261_v28, %v3147_v20  ;;  %v3559_v28 = vld [vmem:[#allocation16_spill] sm:$0xff] }
 0x414   : > { %2266 = vrsqrt.f32 %v1631_v0 }
 0x415   : > { %1770 = vst [vmem:[%s3327_s10 + $0xe0] sm:$0xff] %v1706_v50  ;;  %1771 = vst [vmem:[%s3327_s10 + $0xe8] sm:$0xff] %v1707_v47  ;;  %v1574_v26 = vpop.xlane.xlu0 %1573 }
 0x416   : > { %v2263_v2 = vpop.eup %2262  ;;  %v1632_v31 = vmax.f32 %v1574_v26, 1e-24 }
 0x417   : > { %v1708_v37 = vmul.f32 %v2263_v2, %v3155_v25  ;;  %v1709_v1 = vmul.f32 %v2263_v2, %v3157_v54  ;;  %v3560_v2 = vld [vmem:[#allocation17_spill] sm:$0xff] }
 0x418   : > { %2268 = vrsqrt.f32 %v1632_v31 }
 0x419   : > { %1772 = vst [vmem:[%s3327_s10 + $0xf0] sm:$0xff] %v1708_v37  ;;  %1773 = vst [vmem:[%s3327_s10 + $0xf8] sm:$0xff] %v1709_v1  ;;  %v1577_v33 = vpop.xlane.xlu1 %1576  ;;  %v3561_v37 = vld [vmem:[#allocation18_spill] sm:$0xff] }
 0x41a   : > { %v2265_v7 = vpop.eup %2264  ;;  %v1633_v20 = vmax.f32 %v1577_v33, 1e-24 }
 0x41b   : > { %v1710_v22 = vmul.f32 %v2265_v7, %v3165_v58  ;;  %v1711_v9 = vmul.f32 %v2265_v7, %v3167_v59 }
 0x41c   : > { %2270 = vrsqrt.f32 %v1633_v20 }
 0x41d   : > { %1774 = vst [vmem:[%s3327_s10 + $0x100] sm:$0xff] %v1710_v22  ;;  %1775 = vst [vmem:[%s3327_s10 + $0x108] sm:$0xff] %v1711_v9  ;;  %v1580_v25 = vpop.xlane.xlu0 %1579  ;;  %v3562_v22 = vld [vmem:[#allocation19_spill] sm:$0xff] }
 0x41e   : > { %v2267_v52 = vpop.eup %2266  ;;  %v1634_v54 = vmax.f32 %v1580_v25, 1e-24  ;;  %v3563_v25 = vld [vmem:[#allocation20_spill] sm:$0xff] }
 0x41f   : > { %v1712_v57 = vmul.f32 %v2267_v52, %v3175_v32  ;;  %v1713_v55 = vmul.f32 %v2267_v52, %v3177_v39 }
 0x420   : > { %2272 = vrsqrt.f32 %v1634_v54 }
 0x421   : > { %1776 = vst [vmem:[%s3327_s10 + $0x110] sm:$0xff] %v1712_v57  ;;  %1777 = vst [vmem:[%s3327_s10 + $0x118] sm:$0xff] %v1713_v55  ;;  %v1583_v58 = vpop.xlane.xlu1 %1582 }
 0x422   : > { %v2269_v5 = vpop.eup %2268  ;;  %v1635_v59 = vmax.f32 %v1583_v58, 1e-24  ;;  %v3564_v58 = vld [vmem:[#allocation21_spill] sm:$0xff] }
 0x423   : > { %v1714_v17 = vmul.f32 %v2269_v5, %v3185_v53  ;;  %v1715_v4 = vmul.f32 %v2269_v5, %v3187_v40 }
 0x424   : > { %2274 = vrsqrt.f32 %v1635_v59  ;;  %v3565_v59 = vld [vmem:[#allocation22_spill] sm:$0xff] }
 0x425   : > { %1778 = vst [vmem:[%s3327_s10 + $0x120] sm:$0xff] %v1714_v17  ;;  %1779 = vst [vmem:[%s3327_s10 + $0x128] sm:$0xff] %v1715_v4  ;;  %v1586_v32 = vpop.xlane.xlu0 %1585 }
 0x426   : > { %v2271_v48 = vpop.eup %2270  ;;  %v1636_v39 = vmax.f32 %v1586_v32, 1e-24  ;;  %v3566_v32 = vld [vmem:[#allocation23_spill] sm:$0xff] }
 0x427   : > { %v1716_v8 = vmul.f32 %v2271_v48, %v3195_v51  ;;  %v1717_v19 = vmul.f32 %v2271_v48, %v3197_v56 }
 0x428   : > { %2276 = vrsqrt.f32 %v1636_v39  ;;  %v3567_v39 = vld [vmem:[#allocation24_spill] sm:$0xff] }
 0x429   : > { %1780 = vst [vmem:[%s3327_s10 + $0x130] sm:$0xff] %v1716_v8  ;;  %1781 = vst [vmem:[%s3327_s10 + $0x138] sm:$0xff] %v1717_v19  ;;  %v1589_v53 = vpop.xlane.xlu1 %1588 }
 0x42a   : > { %v2273_v43 = vpop.eup %2272  ;;  %v1637_v40 = vmax.f32 %v1589_v53, 1e-24 }
 0x42b   : > { %v1718_v27 = vmul.f32 %v2273_v43, %v3205_v24  ;;  %v1719_v34 = vmul.f32 %v2273_v43, %v3207_v12 }
 0x42c   : > { %2278 = vrsqrt.f32 %v1637_v40 }
 0x42d   : > { %1782 = vst [vmem:[%s3327_s10 + $0x140] sm:$0xff] %v1718_v27  ;;  %1783 = vst [vmem:[%s3327_s10 + $0x148] sm:$0xff] %v1719_v34  ;;  %v1592_v51 = vpop.xlane.xlu0 %1591  ;;  %v3568_v27 = vld [vmem:[#allocation25_spill] sm:$0xff]  ;;  %v3569_v34 = vld [vmem:[#allocation26_spill] sm:$0xff] }
 0x42e   : > { %v2275_v29 = vpop.eup %2274  ;;  %v1638_v56 = vmax.f32 %v1592_v51, 1e-24 }
 0x42f   : > { %v1720_v35 = vmul.f32 %v2275_v29, %v3215_v13  ;;  %v1721_v3 = vmul.f32 %v2275_v29, %v3217_v41 }
 0x430   : > { %2280 = vrsqrt.f32 %v1638_v56 }
 0x431   : > { %1784 = vst [vmem:[%s3327_s10 + $0x150] sm:$0xff] %v1720_v35  ;;  %1785 = vst [vmem:[%s3327_s10 + $0x158] sm:$0xff] %v1721_v3  ;;  %v1595_v24 = vpop.xlane.xlu1 %1594 }
 0x432   : > { %v2277_v6 = vpop.eup %2276  ;;  %v1639_v12 = vmax.f32 %v1595_v24, 1e-24 }
 0x433   : > { %v1722_v36 = vmul.f32 %v2277_v6, %v3225_v10  ;;  %v1723_v45 = vmul.f32 %v2277_v6, %v3227_v14 }
 0x434   : > { %2282 = vrsqrt.f32 %v1639_v12 }
 0x435   : > { %1786 = vst [vmem:[%s3327_s10 + $0x160] sm:$0xff] %v1722_v36  ;;  %1787 = vst [vmem:[%s3327_s10 + $0x168] sm:$0xff] %v1723_v45  ;;  %v1598_v13 = vpop.xlane.xlu0 %1597 }
 0x436   : > { %v2279_v42 = vpop.eup %2278  ;;  %v1640_v41 = vmax.f32 %v1598_v13, 1e-24 }
 0x437   : > { %v1724_v21 = vmul.f32 %v2279_v42, %v3235_v30  ;;  %v1725_v46 = vmul.f32 %v2279_v42, %v3555_v16 }
 0x438   : > { %2284 = vrsqrt.f32 %v1640_v41 }
 0x439   : > { %1788 = vst [vmem:[%s3327_s10 + $0x170] sm:$0xff] %v1724_v21  ;;  %1789 = vst [vmem:[%s3327_s10 + $0x178] sm:$0xff] %v1725_v46  ;;  %v1601_v10 = vpop.xlane.xlu1 %1600 }
 0x43a   : > { %v2281_v60 = vpop.eup %2280  ;;  %v1641_v14 = vmax.f32 %v1601_v10, 1e-24 }
 0x43b   : > { %v1726_v23 = vmul.f32 %v2281_v60, %v3556_v44  ;;  %v1727_v11 = vmul.f32 %v2281_v60, %v3557_v62 }
 0x43c   : > { %2286 = vrsqrt.f32 %v1641_v14 }
 0x43d   : > { %1790 = vst [vmem:[%s3327_s10 + $0x180] sm:$0xff] %v1726_v23  ;;  %1791 = vst [vmem:[%s3327_s10 + $0x188] sm:$0xff] %v1727_v11  ;;  %v1604_v30 = vpop.xlane.xlu0 %1603 }
 0x43e   : > { %v2283_v38 = vpop.eup %2282  ;;  %v1642_v18 = vmax.f32 %v1604_v30, 1e-24 }
 0x43f   : > { %v1728_v61 = vmul.f32 %v2283_v38, %v3558_v63  ;;  %v1729_v0 = vmul.f32 %v2283_v38, %v3559_v28 }
 0x440   : > { %2288 = vrsqrt.f32 %v1642_v18 }
 0x441   : > { %1792 = vst [vmem:[%s3327_s10 + $0x190] sm:$0xff] %v1728_v61  ;;  %1793 = vst [vmem:[%s3327_s10 + $0x198] sm:$0xff] %v1729_v0  ;;  %v1607_v50 = vpop.xlane.xlu1 %1606 }
 0x442   : > { %v2285_v47 = vpop.eup %2284  ;;  %v1643_v26 = vmax.f32 %v1607_v50, 1e-24 }
 0x443   : > { %v1730_v31 = vmul.f32 %v2285_v47, %v3560_v2  ;;  %v1731_v1 = vmul.f32 %v2285_v47, %v3561_v37 }
 0x444   : > { %2290 = vrsqrt.f32 %v1643_v26 }
 0x445   : > { %1794 = vst [vmem:[%s3327_s10 + $0x1a0] sm:$0xff] %v1730_v31  ;;  %1795 = vst [vmem:[%s3327_s10 + $0x1a8] sm:$0xff] %v1731_v1  ;;  %v1610_v33 = vpop.xlane.xlu0 %1609 }
 0x446   : > { %v2287_v7 = vpop.eup %2286  ;;  %v1644_v20 = vmax.f32 %v1610_v33, 1e-24 }
 0x447   : > { %v1732_v9 = vmul.f32 %v2287_v7, %v3562_v22  ;;  %v1733_v52 = vmul.f32 %v2287_v7, %v3563_v25 }
 0x448   : > { %2292 = vrsqrt.f32 %v1644_v20 }
 0x449   : > { %1796 = vst [vmem:[%s3327_s10 + $0x1b0] sm:$0xff] %v1732_v9  ;;  %1797 = vst [vmem:[%s3327_s10 + $0x1b8] sm:$0xff] %v1733_v52  ;;  %v1613_v54 = vpop.xlane.xlu1 %1612 }
 0x44a   : > { %v2289_v57 = vpop.eup %2288  ;;  %v1645_v55 = vmax.f32 %v1613_v54, 1e-24 }
 0x44b   : > { %v1734_v5 = vmul.f32 %v2289_v57, %v3564_v58  ;;  %v1735_v17 = vmul.f32 %v2289_v57, %v3565_v59 }
 0x44c   : > { %2294 = vrsqrt.f32 %v1645_v55 }
 0x44d   : > { %1798 = vst [vmem:[%s3327_s10 + $0x1c0] sm:$0xff] %v1734_v5  ;;  %1799 = vst [vmem:[%s3327_s10 + $0x1c8] sm:$0xff] %v1735_v17 }
 0x44e   : > { %v2291_v4 = vpop.eup %2290 }
 0x44f   : > { %v1736_v48 = vmul.f32 %v2291_v4, %v3566_v32  ;;  %v1737_v8 = vmul.f32 %v2291_v4, %v3567_v39 }
 0x451   : > { %1800 = vst [vmem:[%s3327_s10 + $0x1d0] sm:$0xff] %v1736_v48  ;;  %1801 = vst [vmem:[%s3327_s10 + $0x1d8] sm:$0xff] %v1737_v8 }
 0x452   : > { %v2293_v19 = vpop.eup %2292 }
 0x453   : > { %v1738_v53 = vmul.f32 %v2293_v19, %v3305_v15  ;;  %v1739_v43 = vmul.f32 %v2293_v19, %v3307_v49 }
 0x455   : > { %1802 = vst [vmem:[%s3327_s10 + $0x1e0] sm:$0xff] %v1738_v53  ;;  %1803 = vst [vmem:[%s3327_s10 + $0x1e8] sm:$0xff] %v1739_v43 }
 0x456   : > { %v2295_v40 = vpop.eup %2294 }
 0x457   : > { %v1740_v15 = vmul.f32 %v2295_v40, %v3568_v27  ;;  %v1741_v51 = vmul.f32 %v2295_v40, %v3569_v34 }
 0x459   : > { %1804 = vst [vmem:[%s3327_s10 + $0x1f0] sm:$0xff] %v1740_v15  ;;  %1805 = vst [vmem:[%s3327_s10 + $0x1f8] sm:$0xff] %v1741_v51 }
 0x45a   : > { %2395 = shalt.err (!%p2392_p1)
}
 0x45b   : > { %s2396_s12 = scalar_lea.hbm %s3456_s11, 8192  ;;  %s2400_s15 = scalar_lea.hbm %s3511_s5, 16384 }
 0x45c   : > { %p2397_p13 = scmp.ne.s32.totalorder %s3456_s11, %s2396_s12  ;;  %p2401_p4 = scmp.lt.u32.totalorder %s3456_s11, %s3511_s5 }
 0x45d   : > { %p2402_p5 = scmp.lt.u32.totalorder %s2400_s15, %s2396_s12  ;;  %p2404_p11 = scmp.lt.u32.totalorder %s2396_s12, %s3456_s11 }
 0x45e   : > { %p2398_p6 = pnand %p2397_p13, %p3570_p0 }
 0x45f   : > { %p2403_p8 = por %p2402_p5, %p2401_p4 }
 0x460   : > { %p2399_p10 = pneg %p2398_p6 }
 0x461   : > { %p2405_p2 = por %p2404_p11, %p2403_p8 }
 0x463   : > { %p2406_p3 = pnand %p2405_p2, %p2399_p10 }
 0x465   : > { %2409 = shalt.err (!%p2406_p3)
}
 0x466   : > { %s2460_s28 = smov 256   ;;  %s2461_s9 = smov 16  }
 0x467   : > { %2171 = dma.vmem_to_hbm [thread:$0]  (%p3570_p0), %s3458_s13, 8192, %s3456_s11, %s1807_s22, %s2460_s28, %s2460_s28, %s2461_s9  }
 0x468 PF: > { %s1836_s30 = sand.u32 1, %s2440_s18   ;;  %p3571_p7 = scmp.ne.s32.totalorder %s3531_s25, 0 }
 0x469   : > { %p3572_p9 = scmp.ge.s32.totalorder %s2452_s21, 2  ;;  %s1837_s17 = scalar_lea.sflag [#allocation4], %s1836_s30 }
 0x46b   : > { %p2185_p12 = pnand %p3572_p9, %p3571_p7 }
 0x46d   : > { %2435 = dma.done.wait (!%p2185_p12), %s1837_s17, 8192  }
 0x46e   : > { %2437 = vsyncadd (!%p2185_p12), %s1837_s17, 4294959104  ;;  %p19_p1 = scmp.ge.s32.totalorder %s2608_s29, 4   ;;  %s3573_s18 = smov %s2444_s19 }
 0x46f   : > { %s3574_s19 = smov %s2448_s20  ;;  %s3575_s20 = smov %s2624_s27 }
 0x470   : > { %s3576_s21 = smov %s2608_s29  ;;  %21 = sbr.rel (!%p19_p1) target bundleno = 6 (0x6), region = 93 }
 0x477   :  { %1842 = vsyncpa [#allocation3], 1 }
 0x478   :  { %1844 = vsyncpa [#allocation3 + $0x1], 1 }
 0x479   :  { %1845 = vsyncpa [#allocation6], 1 }
 0x47a   :  { %1846 = vsyncpa [#allocation4], 1 }
 0x47b   :  { %1848 = vsyncpa [#allocation4 + $0x1], 1 }

</bundles_post_ra>
